<compile_context>
chip_gen: v5e
topology: v5e:2x2
jax: 0.10.0
libtpu: 0.0.40
codegen_flags: <defaults>
</compile_context>

<pallas_src>
import functools

import jax
import jax.numpy as jnp
import numpy as np
from jax.experimental import pallas as pl
from jax.experimental.pallas import tpu as pltpu

# Skeleton definition from VarLoss.__init__ (16 joints, 12 edges, 4 groups).
SKELETON_IDX = [
    [[0, 1], [1, 2], [3, 4], [4, 5]],
    [[10, 11], [11, 12], [13, 14], [14, 15]],
    [[2, 6], [3, 6]],
    [[12, 8], [13, 8]],
]
SKELETON_WEIGHT = [
    [1.0085885098415446, 1.0, 1.0, 1.0085885098415446],
    [1.1375361376887123, 1.0, 1.0, 1.1375361376887123],
    [1.0, 1.0],
    [1.0, 1.0],
]


def _round_up(x, m):
    return ((x + m - 1) // m) * m


def _edge_constants(num_joints):
    """Pack the fused endpoint selector, edge weights and group membership.

    Layout (rows; 8-aligned sections, width padded to 128 lanes):
      [0, K)              : sel (K, 2E): column e   = one-hot of edge e endpoint 1
                                         column E+e = one-hot of edge e endpoint 2
      [ew_row]            : edge weights in columns [0, E)
      [grp_row, +NG)      : group membership (NG, E) in columns [0, E)
    """
    edges = []
    for g, group in enumerate(SKELETON_IDX):
        for j, (i1, i2) in enumerate(group):
            edges.append((i1, i2, SKELETON_WEIGHT[g][j], g))
    n_edges = len(edges)
    n_groups = len(SKELETON_IDX)
    K = num_joints
    K8 = _round_up(K, 8)
    ew_row = K8
    grp_row = _round_up(K8 + 1, 8)
    rows = _round_up(grp_row + n_groups, 8)
    width = max(_round_up(2 * n_edges, 128), 128)
    const = np.zeros((rows, width), np.float32)
    for e, (i1, i2, w, g) in enumerate(edges):
        const[i1, e] = 1.0                 # endpoint-1 selector column
        const[i2, n_edges + e] = 1.0       # endpoint-2 selector column
        const[ew_row, e] = w
        const[grp_row + g, e] = 1.0
    return jnp.asarray(const), n_edges, n_groups, ew_row, grp_row


def _vmem_capacity_bytes():
    try:
        info = pltpu.get_tpu_info()
        cap = getattr(info, "vmem_capacity_bytes", None)
        if cap:
            return int(cap)
    except Exception:
        pass
    return 64 * 1024 * 1024  # conservative fallback (v7x-sized)


def _choose_hw_chunk(hw_pad, max_chunk=2048):
    """Largest lane-aligned divisor of hw_pad that is <= max_chunk."""
    best, c = 128, 128
    while c <= min(hw_pad, max_chunk):
        if hw_pad % c == 0:
            best = c
        c += 128
    return best


def _pick_batch_block(B, C, K, hw_pad, hw_chunk, feat_itemsize, vmem_capacity):
    """Pick a batch tile from the full per-step live set, preferring >= 2 steps.

    Live set per grid step: double-buffered feat block + one-hot + iota (one HW
    chunk each) + gather accumulator + small joint arrays.
    """
    live_budget = min(vmem_capacity // 3, 32 * 1024 * 1024)

    def live_bytes(bb):
        feat_block = bb * C * hw_pad * feat_itemsize
        onehot = bb * K * hw_chunk * feat_itemsize
        iota = bb * K * hw_chunk * 4
        gathered = bb * K * C * 4
        small = bb * K * 4 * 8 + 128 * 1024
        return 2 * feat_block + onehot + iota + 2 * gathered + small

    cands = sorted({B} | {bb for bb in range(8, B + 1, 8) if B % bb == 0})
    fitting = [bb for bb in cands if live_bytes(bb) <= live_budget]
    if not fitting:
        return min(cands)
    multi = [bb for bb in fitting if B // bb >= 2]   # keep >=2 grid steps when possible
    return max(multi) if multi else max(fitting)


def _fusion_loss_kernel(feat_ref, hw_ref, c_ref, mask_ref, target_ref,
                        gtx_ref, gty_ref, const_ref, out_ref,
                        *, num_joints, num_edges, num_groups,
                        ew_row, grp_row, hw_chunk):
    K, E, NG = num_joints, num_edges, num_groups
    bb, C, HWp = feat_ref.shape
    fdt = feat_ref.dtype

    hw_idx = hw_ref[...]          # (bb, K) int32  spatial index (ind // C)
    c_idx = c_ref[...]            # (bb, K) int32  channel index (ind % C)
    mask = mask_ref[...]          # (bb, K) f32
    target = target_ref[...]      # (bb, K) f32 (depth; doubles as "visible")
    gtx = gtx_ref[...]            # (bb, K) f32
    gty = gty_ref[...]            # (bb, K) f32

    # Exact gather for f32 feat; bf16 feat x one-hot accumulates exactly in f32.
    gather_prec = (jax.lax.Precision.HIGHEST if fdt == jnp.float32
                   else jax.lax.Precision.DEFAULT)

    # ---- factored gather, chunked over HW so intermediates stay bounded.
    def gather_chunk(start, acc):
        fchunk = feat_ref[:, :, pl.ds(start, hw_chunk)]           # (bb, C, chunk)
        pos = (jax.lax.broadcasted_iota(jnp.int32, (bb, K, hw_chunk), 2) + start)
        onehot = (pos == hw_idx[:, :, None]).astype(fdt)          # (bb, K, chunk)
        return acc + jax.lax.dot_general(
            onehot, fchunk,
            dimension_numbers=(((2,), (2,)), ((0,), (0,))),
            preferred_element_type=jnp.float32,
            precision=gather_prec)                                # (bb, K, C)

    acc0 = jnp.zeros((bb, K, C), jnp.float32)
    n_chunks = HWp // hw_chunk
    if n_chunks == 1:
        gathered = gather_chunk(0, acc0)
    else:
        gathered = jax.lax.fori_loop(
            0, n_chunks,
            lambda s, acc: gather_chunk(
                pl.multiple_of(s * hw_chunk, hw_chunk), acc),
            acc0)

    c_pos = jax.lax.broadcasted_iota(jnp.int32, (bb, K, C), 2)
    pred = jnp.sum(jnp.where(c_pos == c_idx[:, :, None], gathered, 0.0),
                   axis=2)                                        # (bb, K)

    # ---- reg loss partials: smooth L1 (beta=1, sum) on masked pred/target
    diff = (pred - target) * mask
    ad = jnp.abs(diff)
    sl1_sum = jnp.sum(jnp.where(ad < 1.0, 0.5 * diff * diff, ad - 0.5))
    mask_sum = jnp.sum(mask)

    # ---- var loss partials: ONE fused selector matmul for all 8 selections
    sel = const_ref[0:K, :]                                       # (K, Wc)
    stacked = jnp.concatenate([gtx, gty, pred, target], axis=0)   # (4*bb, K)
    proj = jnp.dot(stacked, sel, preferred_element_type=jnp.float32,
                   precision=jax.lax.Precision.HIGHEST)           # (4*bb, Wc)
    x1 = proj[0 * bb:1 * bb, 0:E]; x2 = proj[0 * bb:1 * bb, E:2 * E]
    y1 = proj[1 * bb:2 * bb, 0:E]; y2 = proj[1 * bb:2 * bb, E:2 * E]
    z1 = proj[2 * bb:3 * bb, 0:E]; z2 = proj[2 * bb:3 * bb, E:2 * E]
    v1 = proj[3 * bb:4 * bb, 0:E]; v2 = proj[3 * bb:4 * bb, E:2 * E]

    ew = const_ref[ew_row:ew_row + 1, 0:E]                        # (1, E)
    grp = const_ref[grp_row:grp_row + NG, 0:E]                    # (NG, E)

    vis = jnp.logical_and(v1 > 0.5, v2 > 0.5).astype(jnp.float32) # (bb, E)
    dist = jnp.sqrt((x1 - x2) ** 2 + (y1 - y2) ** 2 + (z1 - z2) ** 2)
    length = vis * ew * dist                                      # (bb, E)

    num_g = jnp.sum(grp[None, :, :] * vis[:, None, :], axis=2)    # (bb, NG)
    sum_g = jnp.sum(grp[None, :, :] * length[:, None, :], axis=2) # (bb, NG)
    mean_g = jnp.where(num_g > 0.5, sum_g / jnp.maximum(num_g, 1.0), 0.0)
    mean_e = jnp.sum(grp[None, :, :] * mean_g[:, :, None], axis=1)  # (bb, E)
    num_e = jnp.sum(grp[None, :, :] * num_g[:, :, None], axis=1)    # (bb, E)

    contrib = jnp.where(length > 0.0,
                        (length - mean_e) ** 2 * 0.5 / jnp.maximum(num_e, 1.0),
                        0.0)                                      # (bb, E)
    # VarLoss only counts batch elements whose mask sums to zero (mask is 0/1).
    active = (jnp.sum(mask, axis=1, keepdims=True) == 0.0).astype(jnp.float32)
    var_sum = jnp.sum(jnp.sum(contrib, axis=1, keepdims=True) * active)

    # ---- lane-dense per-block partial-sum row: [sl1_sum, mask_sum, var_sum]
    lane = jax.lax.broadcasted_iota(jnp.int32, (1, 8, 128), 2)
    sub = jax.lax.broadcasted_iota(jnp.int32, (1, 8, 128), 1)
    row0 = sub == 0
    out_ref[...] = jnp.where(
        row0 & (lane == 0), sl1_sum,
        jnp.where(row0 & (lane == 1), mask_sum,
                  jnp.where(row0 & (lane == 2), var_sum, 0.0)))


def fusion_loss(output, mask, ind, target, gt_2d, *, reg_weight, var_weight):
    """output: (B, C, H, W) NCHW (f32 or bf16); mask/ind: (B, K);
    target: (B, K, 1); gt_2d: (B, K, 2)."""
    B, C, H, W = output.shape
    K = ind.shape[1]
    HW = H * W
    assert H * W * C < 2 ** 31, "index space must fit int32"

    # Stream the feature map in its native dtype (no upcast); pad HW to 128 lanes.
    feat = output.reshape(B, C, HW)
    HWp = _round_up(HW, 128)
    if HWp != HW:
        feat = jnp.pad(feat, ((0, 0), (0, 0), (0, HWp - HW)))

    # Hoist index decomposition out of the kernel.
    ind32 = ind.astype(jnp.int32)
    hw_idx = ind32 // jnp.int32(C)
    c_idx = ind32 - hw_idx * jnp.int32(C)

    mask_f = mask.reshape(B, K).astype(jnp.float32)
    target2 = target.reshape(B, K).astype(jnp.float32)
    xy = gt_2d.reshape(B, K, 2).astype(jnp.float32)
    gtx, gty = xy[:, :, 0], xy[:, :, 1]

    consts, n_edges, n_groups, ew_row, grp_row = _edge_constants(K)

    feat_itemsize = feat.dtype.itemsize
    capacity = _vmem_capacity_bytes()
    hw_chunk = _choose_hw_chunk(HWp)
    bb = _pick_batch_block(B, C, K, HWp, hw_chunk, feat_itemsize, capacity)
    nb = B // bb
    vmem_limit = int(max(32 * 1024 * 1024,
                         min(capacity * 3 // 4, 112 * 1024 * 1024)))

    kernel = functools.partial(
        _fusion_loss_kernel, num_joints=K, num_edges=n_edges,
        num_groups=n_groups, ew_row=ew_row, grp_row=grp_row, hw_chunk=hw_chunk)

    joint_spec = pl.BlockSpec((bb, K), lambda i: (i, 0))
    cost = pl.CostEstimate(
        flops=2 * B * K * C * HWp + 16 * B * K * n_edges,
        transcendentals=B * n_edges,
        bytes_accessed=(B * C * HWp * feat_itemsize + 6 * B * K * 4
                        + int(consts.size) * 4 + nb * 8 * 128 * 4))

    partials = pl.pallas_call(
        kernel,
        out_shape=jax.ShapeDtypeStruct((nb, 8, 128), jnp.float32),
        grid=(nb,),
        in_specs=[
            pl.BlockSpec((bb, C, HWp), lambda i: (i, 0, 0)),  # feature map tile
            joint_spec,                                       # hw_idx
            joint_spec,                                       # c_idx
            joint_spec,                                       # mask
            joint_spec,                                       # target (depth/vis)
            joint_spec,                                       # gt x
            joint_spec,                                       # gt y
            pl.BlockSpec(consts.shape, lambda i: (0, 0)),     # packed constants
        ],
        out_specs=pl.BlockSpec((1, 8, 128), lambda i: (i, 0, 0)),
        compiler_params=pltpu.CompilerParams(
            dimension_semantics=("parallel",),
            vmem_limit_bytes=vmem_limit),
        cost_estimate=cost,
    )(feat, hw_idx, c_idx, mask_f, target2, gtx, gty, consts)

    sl1_total = jnp.sum(partials[:, 0, 0])
    mask_total = jnp.sum(partials[:, 0, 1])
    var_total = jnp.sum(partials[:, 0, 2])

    loss = jnp.float32(0.0)
    if reg_weight > 0:
        loss = loss + jnp.float32(reg_weight) * sl1_total / (mask_total + 0.0001)
    if var_weight > 0:
        loss = loss + jnp.float32(var_weight) * var_total / jnp.float32(B)
    return loss


def _reference_loss(output, mask, ind, target, gt_2d, reg_weight, var_weight):
    """Pure numpy port of the PyTorch forward (for correctness checking)."""
    output, mask, ind, target, gt_2d = (np.asarray(a, np.float64) if a.dtype != np.int32
                                        else np.asarray(a)
                                        for a in (output, mask, ind, target, gt_2d))
    B, C, H, W = output.shape
    K = ind.shape[1]
    feat = np.transpose(output, (0, 2, 3, 1)).reshape(B, -1)
    pred = np.take_along_axis(feat, ind, axis=1)                  # (B, K)
    tgt = target.reshape(B, K)
    loss = 0.0
    # reg loss
    num = mask.sum()
    d = (pred - tgt) * mask
    ad = np.abs(d)
    sl1 = np.where(ad < 1.0, 0.5 * d * d, ad - 0.5).sum()
    if reg_weight > 0:
        loss += reg_weight * sl1 / (num + 0.0001)
    # var loss
    xy = gt_2d.reshape(B, -1, 2)
    out = 0.0
    for t in range(B):
        if mask[t].sum() == 0:
            for g in range(len(SKELETON_IDX)):
                E, n = 0.0, 0
                N = len(SKELETON_IDX[g])
                l = np.zeros(N)
                for j in range(N):
                    i1, i2 = SKELETON_IDX[g][j]
                    if tgt[t, i1] > 0.5 and tgt[t, i2] > 0.5:
                        l[j] = (((xy[t, i1] - xy[t, i2]) ** 2).sum()
                                + (pred[t, i1] - pred[t, i2]) ** 2) ** 0.5
                        l[j] *= SKELETON_WEIGHT[g][j]
                        n += 1
                        E += l[j]
                E = 0.0 if n < 0.5 else E / n
                for j in range(N):
                    if l[j] > 0:
                        out += (l[j] - E) ** 2 / 2.0 / n
    if var_weight > 0:
        loss += var_weight * out / B
    return loss


if __name__ == "__main__":
    key = jax.random.PRNGKey(0)
    B, C, H, W, K = 2, 16, 16, 16, 16
    k1, k2, k3, k4 = jax.random.split(key, 4)

    output = jax.random.normal(k1, (B, C, H, W), jnp.float32)
    ind = jax.random.randint(k2, (B, K), 0, H * W * C, jnp.int32)
    # batch 0: all joints regressed (reg loss); batch 1: empty mask (var loss path)
    mask = jnp.concatenate([jnp.ones((1, K)), jnp.zeros((1, K))], axis=0).astype(jnp.float32)
    target = jax.random.uniform(k3, (B, K, 1), jnp.float32)        # depth / visibility
    gt_2d = jax.random.uniform(k4, (B, K, 2), jnp.float32) * 16.0

    reg_weight, var_weight = 0.1, 0.01

    loss = fusion_loss(output, mask, ind, target, gt_2d,
                       reg_weight=reg_weight, var_weight=var_weight)
    loss = jax.block_until_ready(loss)

    ref = _reference_loss(np.asarray(output), np.asarray(mask), np.asarray(ind),
                          np.asarray(target), np.asarray(gt_2d),
                          reg_weight, var_weight)
    assert np.isclose(float(loss), float(ref), rtol=1e-3, atol=1e-4), (float(loss), float(ref))
    print("KERNEL_OK")
</pallas_src>

<mosaic_0001>
module attributes {stable_mosaic.version = 11 : i64} {
  func.func @_fusion_loss_kernel(%arg0: i32, %arg1: memref<2x16x256xf32, #tpu.memory_space<vmem>>, %arg2: memref<2x16xi32, #tpu.memory_space<vmem>>, %arg3: memref<2x16xi32, #tpu.memory_space<vmem>>, %arg4: memref<2x16xf32, #tpu.memory_space<vmem>>, %arg5: memref<2x16xf32, #tpu.memory_space<vmem>>, %arg6: memref<2x16xf32, #tpu.memory_space<vmem>>, %arg7: memref<2x16xf32, #tpu.memory_space<vmem>>, %arg8: memref<32x128xf32, #tpu.memory_space<vmem>>, %arg9: memref<1x8x128xf32, #tpu.memory_space<vmem>>) attributes {dimension_semantics = [#tpu.dimension_semantics<parallel>], iteration_bounds = array<i64: 1>, scalar_prefetch = 0 : i64, scratch_operands = 0 : i64, tpu.core_type = #tpu.core_type<tc>, window_params = [{transform_indices = @transform_0, window_bounds = array<i64: 2, 16, 256>}, {transform_indices = @transform_1, window_bounds = array<i64: 2, 16>}, {transform_indices = @transform_2, window_bounds = array<i64: 2, 16>}, {transform_indices = @transform_3, window_bounds = array<i64: 2, 16>}, {transform_indices = @transform_4, window_bounds = array<i64: 2, 16>}, {transform_indices = @transform_5, window_bounds = array<i64: 2, 16>}, {transform_indices = @transform_6, window_bounds = array<i64: 2, 16>}, {pipeline_mode = #tpu.pipeline_mode<synchronous>, transform_indices = @transform_7, window_bounds = array<i64: 32, 128>}, {transform_indices = @transform_8, window_bounds = array<i64: 1, 8, 128>}]} {
    %c0 = arith.constant 0 : index
    %c0_0 = arith.constant 0 : index
    %0 = vector.load %arg2[%c0, %c0_0] : memref<2x16xi32, #tpu.memory_space<vmem>>, vector<2x16xi32>
    %c0_1 = arith.constant 0 : index
    %c0_2 = arith.constant 0 : index
    %1 = vector.load %arg3[%c0_1, %c0_2] : memref<2x16xi32, #tpu.memory_space<vmem>>, vector<2x16xi32>
    %c0_3 = arith.constant 0 : index
    %c0_4 = arith.constant 0 : index
    %2 = vector.load %arg4[%c0_3, %c0_4] : memref<2x16xf32, #tpu.memory_space<vmem>>, vector<2x16xf32>
    %c0_5 = arith.constant 0 : index
    %c0_6 = arith.constant 0 : index
    %3 = vector.load %arg5[%c0_5, %c0_6] : memref<2x16xf32, #tpu.memory_space<vmem>>, vector<2x16xf32>
    %c0_7 = arith.constant 0 : index
    %c0_8 = arith.constant 0 : index
    %4 = vector.load %arg6[%c0_7, %c0_8] : memref<2x16xf32, #tpu.memory_space<vmem>>, vector<2x16xf32>
    %c0_9 = arith.constant 0 : index
    %c0_10 = arith.constant 0 : index
    %5 = vector.load %arg7[%c0_9, %c0_10] : memref<2x16xf32, #tpu.memory_space<vmem>>, vector<2x16xf32>
    %cst = arith.constant 0.000000e+00 : f32
    %6 = vector.broadcast %cst : f32 to vector<2x16x16xf32>
    %c0_11 = arith.constant 0 : index
    %c0_12 = arith.constant 0 : index
    %c0_13 = arith.constant 0 : index
    %7 = vector.load %arg1[%c0_11, %c0_12, %c0_13] : memref<2x16x256xf32, #tpu.memory_space<vmem>>, vector<2x16x256xf32>
    %8 = tpu.iota {dimensions = array<i32: 2>} : vector<2x16x256xi32>
    %c0_i32 = arith.constant 0 : i32
    %9 = vector.broadcast %c0_i32 : i32 to vector<2x16x256xi32>
    %10 = arith.addi %8, %9 : vector<2x16x256xi32>
    %11 = vector.shape_cast %0 : vector<2x16xi32> to vector<2x16x1xi32>
    %12 = vector.broadcast %11 : vector<2x16x1xi32> to vector<2x16x256xi32>
    %13 = arith.cmpi eq, %10, %12 : vector<2x16x256xi32>
    %14 = arith.extui %13 : vector<2x16x256xi1> to vector<2x16x256xi32>
    %15 = arith.sitofp %14 : vector<2x16x256xi32> to vector<2x16x256xf32>
    %cst_14 = arith.constant dense<0.000000e+00> : vector<2x16x16xf32>
    %16 = tpu.matmul %15, %7, %cst_14 {dimension_numbers = #tpu.dot_dimension_numbers<[2], [2], [1], [1], [0, 0, 0, 1, 1, 1], [0], [0]>, precision = #tpu.contract_precision<fp32>} : vector<2x16x256xf32>, vector<2x16x256xf32>, vector<2x16x16xf32> -> vector<2x16x16xf32>
    %17 = arith.addf %6, %16 : vector<2x16x16xf32>
    %18 = tpu.iota {dimensions = array<i32: 2>} : vector<2x16x16xi32>
    %19 = vector.shape_cast %1 : vector<2x16xi32> to vector<2x16x1xi32>
    %20 = vector.broadcast %19 : vector<2x16x1xi32> to vector<2x16x16xi32>
    %21 = arith.cmpi eq, %18, %20 : vector<2x16x16xi32>
    %cst_15 = arith.constant 0.000000e+00 : f32
    %22 = vector.broadcast %cst_15 : f32 to vector<2x16x16xf32>
    %23 = arith.select %21, %17, %22 : vector<2x16x16xi1>, vector<2x16x16xf32>
    %cst_16 = arith.constant dense<0.000000e+00> : vector<2x16xf32>
    %24 = vector.multi_reduction <add>, %23, %cst_16 [2] : vector<2x16x16xf32> to vector<2x16xf32>
    %25 = arith.subf %24, %3 : vector<2x16xf32>
    %26 = arith.mulf %25, %2 : vector<2x16xf32>
    %27 = math.absf %26 : vector<2x16xf32>
    %cst_17 = arith.constant 1.000000e+00 : f32
    %28 = vector.broadcast %cst_17 : f32 to vector<2x16xf32>
    %29 = arith.cmpf olt, %27, %28 : vector<2x16xf32>
    %cst_18 = arith.constant 5.000000e-01 : f32
    %30 = vector.broadcast %cst_18 : f32 to vector<2x16xf32>
    %31 = arith.mulf %30, %26 : vector<2x16xf32>
    %32 = arith.mulf %31, %26 : vector<2x16xf32>
    %cst_19 = arith.constant 5.000000e-01 : f32
    %33 = vector.broadcast %cst_19 : f32 to vector<2x16xf32>
    %34 = arith.subf %27, %33 : vector<2x16xf32>
    %35 = arith.select %29, %32, %34 : vector<2x16xi1>, vector<2x16xf32>
    %36 = vector.shape_cast %35 : vector<2x16xf32> to vector<1x2x16xf32>
    %cst_20 = arith.constant dense<0.000000e+00> : vector<1xf32>
    %37 = vector.multi_reduction <add>, %36, %cst_20 [1, 2] : vector<1x2x16xf32> to vector<1xf32>
    %38 = vector.shape_cast %37 : vector<1xf32> to vector<1x1x1xf32>
    %39 = vector.extract %38[0, 0, 0] : f32 from vector<1x1x1xf32>
    %40 = vector.shape_cast %2 : vector<2x16xf32> to vector<1x2x16xf32>
    %cst_21 = arith.constant dense<0.000000e+00> : vector<1xf32>
    %41 = vector.multi_reduction <add>, %40, %cst_21 [1, 2] : vector<1x2x16xf32> to vector<1xf32>
    %42 = vector.shape_cast %41 : vector<1xf32> to vector<1x1x1xf32>
    %43 = vector.extract %42[0, 0, 0] : f32 from vector<1x1x1xf32>
    %c0_22 = arith.constant 0 : index
    %c0_23 = arith.constant 0 : index
    %44 = vector.load %arg8[%c0_22, %c0_23] : memref<32x128xf32, #tpu.memory_space<vmem>>, vector<16x128xf32>
    %45 = tpu.concatenate %4, %5, %24, %3 in 0 : vector<2x16xf32>, vector<2x16xf32>, vector<2x16xf32>, vector<2x16xf32> -> vector<8x16xf32>
    %cst_24 = arith.constant dense<0.000000e+00> : vector<8x128xf32>
    %46 = tpu.matmul %45, %44, %cst_24 {dimension_numbers = #tpu.dot_dimension_numbers<[1], [0], [0], [1], [0, 0, 1, 1], [], []>, precision = #tpu.contract_precision<fp32>} : vector<8x16xf32>, vector<16x128xf32>, vector<8x128xf32> -> vector<8x128xf32>
    %47 = vector.extract_strided_slice %46 {offsets = [0, 0], sizes = [2, 12], strides = [1, 1]} : vector<8x128xf32> to vector<2x12xf32>
    %48 = vector.extract_strided_slice %46 {offsets = [0, 12], sizes = [2, 12], strides = [1, 1]} : vector<8x128xf32> to vector<2x12xf32>
    %49 = vector.extract_strided_slice %46 {offsets = [2, 0], sizes = [2, 12], strides = [1, 1]} : vector<8x128xf32> to vector<2x12xf32>
    %50 = vector.extract_strided_slice %46 {offsets = [2, 12], sizes = [2, 12], strides = [1, 1]} : vector<8x128xf32> to vector<2x12xf32>
    %51 = vector.extract_strided_slice %46 {offsets = [4, 0], sizes = [2, 12], strides = [1, 1]} : vector<8x128xf32> to vector<2x12xf32>
    %52 = vector.extract_strided_slice %46 {offsets = [4, 12], sizes = [2, 12], strides = [1, 1]} : vector<8x128xf32> to vector<2x12xf32>
    %53 = vector.extract_strided_slice %46 {offsets = [6, 0], sizes = [2, 12], strides = [1, 1]} : vector<8x128xf32> to vector<2x12xf32>
    %54 = vector.extract_strided_slice %46 {offsets = [6, 12], sizes = [2, 12], strides = [1, 1]} : vector<8x128xf32> to vector<2x12xf32>
    %c16 = arith.constant 16 : index
    %c0_25 = arith.constant 0 : index
    %55 = vector.load %arg8[%c16, %c0_25] : memref<32x128xf32, #tpu.memory_space<vmem>>, vector<1x12xf32>
    %c24 = arith.constant 24 : index
    %c0_26 = arith.constant 0 : index
    %56 = vector.load %arg8[%c24, %c0_26] : memref<32x128xf32, #tpu.memory_space<vmem>>, vector<4x12xf32>
    %cst_27 = arith.constant 5.000000e-01 : f32
    %57 = vector.broadcast %cst_27 : f32 to vector<2x12xf32>
    %58 = arith.cmpf ogt, %53, %57 : vector<2x12xf32>
    %cst_28 = arith.constant 5.000000e-01 : f32
    %59 = vector.broadcast %cst_28 : f32 to vector<2x12xf32>
    %60 = arith.cmpf ogt, %54, %59 : vector<2x12xf32>
    %61 = arith.andi %58, %60 : vector<2x12xi1>
    %62 = arith.extui %61 : vector<2x12xi1> to vector<2x12xi32>
    %63 = arith.sitofp %62 : vector<2x12xi32> to vector<2x12xf32>
    %64 = arith.subf %47, %48 : vector<2x12xf32>
    %65 = arith.mulf %64, %64 : vector<2x12xf32>
    %66 = arith.subf %49, %50 : vector<2x12xf32>
    %67 = arith.mulf %66, %66 : vector<2x12xf32>
    %68 = arith.addf %65, %67 : vector<2x12xf32>
    %69 = arith.subf %51, %52 : vector<2x12xf32>
    %70 = arith.mulf %69, %69 : vector<2x12xf32>
    %71 = arith.addf %68, %70 : vector<2x12xf32>
    %72 = math.sqrt %71 : vector<2x12xf32>
    %73 = vector.broadcast %55 : vector<1x12xf32> to vector<2x12xf32>
    %74 = arith.mulf %63, %73 : vector<2x12xf32>
    %75 = arith.mulf %74, %72 : vector<2x12xf32>
    %76 = vector.shape_cast %56 : vector<4x12xf32> to vector<1x4x12xf32>
    %77 = vector.shape_cast %63 : vector<2x12xf32> to vector<2x1x12xf32>
    %78 = vector.broadcast %76 : vector<1x4x12xf32> to vector<2x4x12xf32>
    %79 = vector.broadcast %77 : vector<2x1x12xf32> to vector<2x4x12xf32>
    %80 = arith.mulf %78, %79 : vector<2x4x12xf32>
    %cst_29 = arith.constant dense<0.000000e+00> : vector<2x4xf32>
    %81 = vector.multi_reduction <add>, %80, %cst_29 [2] : vector<2x4x12xf32> to vector<2x4xf32>
    %82 = vector.shape_cast %56 : vector<4x12xf32> to vector<1x4x12xf32>
    %83 = vector.shape_cast %75 : vector<2x12xf32> to vector<2x1x12xf32>
    %84 = vector.broadcast %82 : vector<1x4x12xf32> to vector<2x4x12xf32>
    %85 = vector.broadcast %83 : vector<2x1x12xf32> to vector<2x4x12xf32>
    %86 = arith.mulf %84, %85 : vector<2x4x12xf32>
    %cst_30 = arith.constant dense<0.000000e+00> : vector<2x4xf32>
    %87 = vector.multi_reduction <add>, %86, %cst_30 [2] : vector<2x4x12xf32> to vector<2x4xf32>
    %cst_31 = arith.constant 5.000000e-01 : f32
    %88 = vector.broadcast %cst_31 : f32 to vector<2x4xf32>
    %89 = arith.cmpf ogt, %81, %88 : vector<2x4xf32>
    %cst_32 = arith.constant 1.000000e+00 : f32
    %90 = vector.broadcast %cst_32 : f32 to vector<2x4xf32>
    %91 = arith.maximumf %81, %90 : vector<2x4xf32>
    %92 = arith.divf %87, %91 : vector<2x4xf32>
    %cst_33 = arith.constant 0.000000e+00 : f32
    %93 = vector.broadcast %cst_33 : f32 to vector<2x4xf32>
    %94 = arith.select %89, %92, %93 : vector<2x4xi1>, vector<2x4xf32>
    %95 = vector.shape_cast %56 : vector<4x12xf32> to vector<1x4x12xf32>
    %96 = vector.shape_cast %94 : vector<2x4xf32> to vector<2x4x1xf32>
    %97 = vector.broadcast %95 : vector<1x4x12xf32> to vector<2x4x12xf32>
    %98 = vector.broadcast %96 : vector<2x4x1xf32> to vector<2x4x12xf32>
    %99 = arith.mulf %97, %98 : vector<2x4x12xf32>
    %cst_34 = arith.constant dense<0.000000e+00> : vector<2x12xf32>
    %100 = vector.multi_reduction <add>, %99, %cst_34 [1] : vector<2x4x12xf32> to vector<2x12xf32>
    %101 = vector.shape_cast %56 : vector<4x12xf32> to vector<1x4x12xf32>
    %102 = vector.shape_cast %81 : vector<2x4xf32> to vector<2x4x1xf32>
    %103 = vector.broadcast %101 : vector<1x4x12xf32> to vector<2x4x12xf32>
    %104 = vector.broadcast %102 : vector<2x4x1xf32> to vector<2x4x12xf32>
    %105 = arith.mulf %103, %104 : vector<2x4x12xf32>
    %cst_35 = arith.constant dense<0.000000e+00> : vector<2x12xf32>
    %106 = vector.multi_reduction <add>, %105, %cst_35 [1] : vector<2x4x12xf32> to vector<2x12xf32>
    %cst_36 = arith.constant 0.000000e+00 : f32
    %107 = vector.broadcast %cst_36 : f32 to vector<2x12xf32>
    %108 = arith.cmpf ogt, %75, %107 : vector<2x12xf32>
    %109 = arith.subf %75, %100 : vector<2x12xf32>
    %110 = arith.mulf %109, %109 : vector<2x12xf32>
    %cst_37 = arith.constant 5.000000e-01 : f32
    %111 = vector.broadcast %cst_37 : f32 to vector<2x12xf32>
    %112 = arith.mulf %110, %111 : vector<2x12xf32>
    %cst_38 = arith.constant 1.000000e+00 : f32
    %113 = vector.broadcast %cst_38 : f32 to vector<2x12xf32>
    %114 = arith.maximumf %106, %113 : vector<2x12xf32>
    %115 = arith.divf %112, %114 : vector<2x12xf32>
    %cst_39 = arith.constant 0.000000e+00 : f32
    %116 = vector.broadcast %cst_39 : f32 to vector<2x12xf32>
    %117 = arith.select %108, %115, %116 : vector<2x12xi1>, vector<2x12xf32>
    %cst_40 = arith.constant dense<0.000000e+00> : vector<2xf32>
    %118 = vector.multi_reduction <add>, %2, %cst_40 [1] : vector<2x16xf32> to vector<2xf32>
    %119 = vector.shape_cast %118 : vector<2xf32> to vector<2x1xf32>
    %cst_41 = arith.constant 0.000000e+00 : f32
    %120 = vector.broadcast %cst_41 : f32 to vector<2x1xf32>
    %121 = arith.cmpf oeq, %119, %120 : vector<2x1xf32>
    %122 = arith.extui %121 : vector<2x1xi1> to vector<2x1xi32>
    %123 = arith.sitofp %122 : vector<2x1xi32> to vector<2x1xf32>
    %cst_42 = arith.constant dense<0.000000e+00> : vector<2xf32>
    %124 = vector.multi_reduction <add>, %117, %cst_42 [1] : vector<2x12xf32> to vector<2xf32>
    %125 = vector.shape_cast %124 : vector<2xf32> to vector<2x1xf32>
    %126 = arith.mulf %125, %123 : vector<2x1xf32>
    %127 = vector.shape_cast %126 : vector<2x1xf32> to vector<1x2x1xf32>
    %cst_43 = arith.constant dense<0.000000e+00> : vector<1xf32>
    %128 = vector.multi_reduction <add>, %127, %cst_43 [1, 2] : vector<1x2x1xf32> to vector<1xf32>
    %129 = vector.shape_cast %128 : vector<1xf32> to vector<1x1x1xf32>
    %130 = vector.extract %129[0, 0, 0] : f32 from vector<1x1x1xf32>
    %131 = tpu.iota {dimensions = array<i32: 2>} : vector<1x8x128xi32>
    %132 = tpu.iota {dimensions = array<i32: 1>} : vector<1x8x128xi32>
    %c0_i32_44 = arith.constant 0 : i32
    %133 = vector.broadcast %c0_i32_44 : i32 to vector<1x8x128xi32>
    %134 = arith.cmpi eq, %132, %133 : vector<1x8x128xi32>
    %c0_i32_45 = arith.constant 0 : i32
    %135 = vector.broadcast %c0_i32_45 : i32 to vector<1x8x128xi32>
    %136 = arith.cmpi eq, %131, %135 : vector<1x8x128xi32>
    %137 = arith.andi %134, %136 : vector<1x8x128xi1>
    %c1_i32 = arith.constant 1 : i32
    %138 = vector.broadcast %c1_i32 : i32 to vector<1x8x128xi32>
    %139 = arith.cmpi eq, %131, %138 : vector<1x8x128xi32>
    %140 = arith.andi %134, %139 : vector<1x8x128xi1>
    %c2_i32 = arith.constant 2 : i32
    %141 = vector.broadcast %c2_i32 : i32 to vector<1x8x128xi32>
    %142 = arith.cmpi eq, %131, %141 : vector<1x8x128xi32>
    %143 = arith.andi %134, %142 : vector<1x8x128xi1>
    %cst_46 = arith.constant 0.000000e+00 : f32
    %144 = vector.broadcast %130 : f32 to vector<1x8x128xf32>
    %145 = vector.broadcast %cst_46 : f32 to vector<1x8x128xf32>
    %146 = arith.select %143, %144, %145 : vector<1x8x128xi1>, vector<1x8x128xf32>
    %147 = vector.broadcast %43 : f32 to vector<1x8x128xf32>
    %148 = arith.select %140, %147, %146 : vector<1x8x128xi1>, vector<1x8x128xf32>
    %149 = vector.broadcast %39 : f32 to vector<1x8x128xf32>
    %150 = arith.select %137, %149, %148 : vector<1x8x128xi1>, vector<1x8x128xf32>
    %c0_47 = arith.constant 0 : index
    %c0_48 = arith.constant 0 : index
    %c0_49 = arith.constant 0 : index
    %151 = vector.load %arg9[%c0_47, %c0_48, %c0_49] : memref<1x8x128xf32, #tpu.memory_space<vmem>>, vector<1x8x128xf32>
    tpu.vector_store %arg9[%c0_47, %c0_48, %c0_49], %150 {strides = array<i32>} : memref<1x8x128xf32, #tpu.memory_space<vmem>>, vector<1x8x128xf32>,
    return
  }
  func.func @transform_0(%arg0: i32) -> (i32, i32, i32) {
    %c0_i32 = arith.constant 0 : i32
    %c0_i32_0 = arith.constant 0 : i32
    %c0_i32_1 = arith.constant 0 : i32
    return %arg0, %c0_i32, %c0_i32_0 : i32, i32, i32
  }
  func.func @transform_1(%arg0: i32) -> (i32, i32) {
    %c0_i32 = arith.constant 0 : i32
    %c0_i32_0 = arith.constant 0 : i32
    return %arg0, %c0_i32 : i32, i32
  }
  func.func @transform_2(%arg0: i32) -> (i32, i32) {
    %c0_i32 = arith.constant 0 : i32
    %c0_i32_0 = arith.constant 0 : i32
    return %arg0, %c0_i32 : i32, i32
  }
  func.func @transform_3(%arg0: i32) -> (i32, i32) {
    %c0_i32 = arith.constant 0 : i32
    %c0_i32_0 = arith.constant 0 : i32
    return %arg0, %c0_i32 : i32, i32
  }
  func.func @transform_4(%arg0: i32) -> (i32, i32) {
    %c0_i32 = arith.constant 0 : i32
    %c0_i32_0 = arith.constant 0 : i32
    return %arg0, %c0_i32 : i32, i32
  }
  func.func @transform_5(%arg0: i32) -> (i32, i32) {
    %c0_i32 = arith.constant 0 : i32
    %c0_i32_0 = arith.constant 0 : i32
    return %arg0, %c0_i32 : i32, i32
  }
  func.func @transform_6(%arg0: i32) -> (i32, i32) {
    %c0_i32 = arith.constant 0 : i32
    %c0_i32_0 = arith.constant 0 : i32
    return %arg0, %c0_i32 : i32, i32
  }
  func.func @transform_7(%arg0: i32) -> (i32, i32) {
    %c0_i32 = arith.constant 0 : i32
    %c0_i32_0 = arith.constant 0 : i32
    %c0_i32_1 = arith.constant 0 : i32
    return %c0_i32, %c0_i32_0 : i32, i32
  }
  func.func @transform_8(%arg0: i32) -> (i32, i32, i32) {
    %c0_i32 = arith.constant 0 : i32
    %c0_i32_0 = arith.constant 0 : i32
    %c0_i32_1 = arith.constant 0 : i32
    return %arg0, %c0_i32, %c0_i32_0 : i32, i32, i32
  }
}

</mosaic_0001>

<bundles_post_ra>
// kernel: tpu_custom_call.1
= control target key start
LH: loop header
LB: loop body
LE: loop exit
PB: predicated region body
PF: predicated region fallthrough
CT: control target
= control target key end

     0   :  { %13 = vsyncpa [#allocation3], 0  ;;  %s2249_s0 = inlined_call_operand.hbm [shape: f32[2,16,256], index: 0, kind: input, shape index: {}]   ;;  %s2250_s1 = inlined_call_operand.hbm [shape: s32[2,16], index: 1, kind: input, shape index: {}]   ;;  %s2251_s2 = inlined_call_operand.hbm [shape: s32[2,16], index: 2, kind: input, shape index: {}]   ;;  %s2252_s3 = inlined_call_operand.vmem [shape: f32[2,16], index: 3, kind: input, shape index: {}]   ;;  %s2253_s4 = inlined_call_operand.hbm [shape: f32[2,16], index: 4, kind: input, shape index: {}]   ;;  %s2254_s5 = inlined_call_operand.vmem [shape: f32[2,16], index: 5, kind: input, shape index: {}]   ;;  %s2255_s6 = inlined_call_operand.hbm [shape: f32[2,16], index: 6, kind: input, shape index: {}]   ;;  %s2256_s7 = inlined_call_operand.hbm [shape: f32[32,128], index: 7, kind: input, shape index: {}]   ;;  %s2257_s8 = inlined_call_operand.hbm [shape: f32[1,8,128], index: 8, kind: output, shape index: {}]  }
   0x1   :  { %14 = vsyncpa [#allocation6], 0 }
   0x2   :  { %15 = vsyncpa [#allocation9], 0 }
   0x3   :  { %16 = vsyncpa [#allocation12], 0  ;;  %s36_s29 = sshll.u32 %s2250_s1, 4  ;;  %s37_s29 = int_to_ptr.hbm [resolvable:$true] %s36_s29 }
   0x4   :  { %17 = vsyncpa [#allocation4], 0  ;;  %s1815_s30 = smov [#allocation5]   ;;  %s60_s12 = sshll.u32 %s2253_s4, 4  ;;  %s61_s12 = int_to_ptr.hbm [resolvable:$true] %s60_s12 }
   0x5   :  { %s38_s9 = sshll.u32 %s1815_s30, 4  ;;  %s1816_s13 = smov [#allocation8]   ;;  %s39_s9 = int_to_ptr.vmem [resolvable:$true] %s38_s9 }
   0x6   :  { %41 = dma.hbm_to_vmem [thread:$0]  %s37_s29, 32, %s39_s9, [#allocation6]  }
   0x7   :  { %s62_s14 = sshll.u32 %s1816_s13, 4  ;;  %s22_s17 = sshll.u32 %s2249_s0, 4  ;;  %s63_s14 = int_to_ptr.vmem [resolvable:$true] %s62_s14  ;;  %s23_s17 = int_to_ptr.hbm [resolvable:$true] %s22_s17 }
   0x8   :  { %65 = dma.hbm_to_vmem [thread:$0]  %s61_s12, 32, %s63_s14, [#allocation9]  }
   0x9   :  { %s1817_s1 = smov [#allocation2]   ;;  %s47_s21 = sshll.u32 %s2251_s2, 4  ;;  %s48_s21 = int_to_ptr.hbm [resolvable:$true] %s47_s21 }
   0xa   :  { %s24_s18 = sshll.u32 %s1817_s1, 4  ;;  %s1818_s22 = smov 256   ;;  %s25_s18 = int_to_ptr.vmem [resolvable:$true] %s24_s18 }
   0xb   :  { %s1819_s4 = smov 16   ;;  %s1820_s23 = smov [#allocation7]  }
   0xc   :  { %30 = dma.hbm_to_vmem [thread:$0]  %s23_s17, 1024, %s25_s18, [#allocation3], %s1818_s22, %s1818_s22, %s1819_s4  }
   0xd   :  { %s49_s24 = sshll.u32 %s1820_s23, 4  ;;  %s73_s0 = sshll.u32 %s2255_s6, 4  ;;  %s50_s24 = int_to_ptr.vmem [resolvable:$true] %s49_s24  ;;  %s74_s0 = int_to_ptr.hbm [resolvable:$true] %s73_s0 }
   0xe   :  { %52 = dma.hbm_to_vmem [thread:$0]  %s48_s21, 32, %s50_s24, [#allocation6]  }
   0xf   :  { %s83_s29 = sshll.u32 %s2256_s7, 4  ;;  %s1821_s30 = smov [#allocation10]   ;;  %s84_s29 = int_to_ptr.hbm [resolvable:$true] %s83_s29 }
  0x10   :  { %s75_s9 = sshll.u32 %s1821_s30, 4  ;;  %s1822_s2 = smov [#allocation11]   ;;  %s76_s9 = int_to_ptr.vmem [resolvable:$true] %s75_s9 }
  0x11   :  { %78 = dma.hbm_to_vmem [thread:$0]  %s74_s0, 32, %s76_s9, [#allocation9]  }
  0x12   :  { %s85_s10 = sshll.u32 %s1822_s2, 4  ;;  %s1823_s11 = smov 128   ;;  %s86_s10 = int_to_ptr.vmem [resolvable:$true] %s85_s10 }
  0x13   :  { %s1824_s12 = smov 8  }
  0x14   :  { %91 = dma.hbm_to_vmem [thread:$0]  %s84_s29, 512, %s86_s10, [#allocation12], %s1823_s11, %s1823_s11, %s1824_s12  }
  0x15   :  { %1805 = dma.done.wait [#allocation3], 1024  }
  0x16   :  { %1806 = vsyncadd [#allocation3], 4294966272 }
  0x17   :  { %1807 = dma.done.wait [#allocation6], 64  }
  0x18   :  { %1808 = vsyncadd [#allocation6], 4294967232 }
  0x19   :  { %1809 = dma.done.wait [#allocation9], 64  }
  0x1a   :  { %1810 = vsyncadd [#allocation9], 4294967232 }
  0x1b   :  { %1811 = dma.done.wait [#allocation12], 512  }
  0x1c   :  { %1812 = vsyncadd [#allocation12], 4294966784  ;;  %v130_v0 = vlaneseq  ;;  %v116_v2 = vld [vmem:[#allocation5] sm:$0x3]  ;;  %v124_v3 = vld [vmem:[#allocation2 + $0x10] sm:$0xff]  ;;  %v1825_v32 = vmov 1.0  }
  0x1d   :  { %v122_v4 = vld [vmem:[#allocation2] sm:$0xff]  ;;  %v133_v5 = vperm.slane %v116_v2, 0  ;;  %v146_v6 = vperm.slane %v116_v2, 1  ;;  %v197_v7 = vand.u32 4294901760, %v124_v3  ;;  %v125_v18 = vld [vmem:[#allocation2 + $0x18] sm:$0xff]  ;;  %v123_v21 = vld [vmem:[#allocation2 + $0x8] sm:$0xff] }
  0x1e   :  { %v1893_v1 = vshrl.u32 %v130_v0, 7  ;;  %v199_v8 = vand.u32 4294901760, %v122_v4  ;;  %v387_v19 = vand.u32 4294901760, %v125_v18  ;;  %v389_v23 = vand.u32 4294901760, %v123_v21  ;;  %v128_v39 = vld [vmem:[#allocation2 + $0x30] sm:$0xff]  ;;  %v126_v44 = vld [vmem:[#allocation2 + $0x20] sm:$0xff] }
  0x1f   :  { %v233_v9 = vsub.f32 %v124_v3, %v197_v7  ;;  %299 = vmatpush.xpose.msra.mxu3 %v197_v7  ;;  %198 = vmatpush.xpose.msra.mxu0 %v197_v7  ;;  %v1904_v30 = vand.u32 127, %v130_v0  ;;  %v1826_v33 = vmov 0.0   ;;  %v1923_v41 = vand.u32 4294901760, %v128_v39  ;;  %v129_v3 = vld [vmem:[#allocation2 + $0x38] sm:$0xff]  ;;  %s1829_s16 = smov [#allocation13]   ;;  %s1545_s20 = sshll.u32 %s2257_s8, 4  ;;  %s1546_s20 = int_to_ptr.hbm [resolvable:$true] %s1545_s20 }
  0x20   :  { %1617 = vset.pattern.permute.xlu0 %v1893_v1  ;;  %1619 = vset.pattern.permute.xlu1 %v1893_v1  ;;  %v239_v10 = vsub.f32 %v122_v4, %v199_v8  ;;  %v1899_v15 = vadd.s32 8, %v1893_v1  ;;  %v423_v20 = vsub.f32 %v125_v18, %v387_v19  ;;  %v429_v25 = vsub.f32 %v123_v21, %v389_v23  ;;  %s1543_s17 = sshll.u32 %s1829_s16, 4  ;;  %s1544_s17 = int_to_ptr.vmem [resolvable:$true] %s1543_s17 }
  0x21   :  { %1621 = vset.pattern.permute.xlu2 %v1893_v1  ;;  %v234_v11 = vand.u32 4294901760, %v233_v9  ;;  %269 = vmatpush.xpose.msra.mxu2 %v233_v9  ;;  %v1919_v36 = vadd.s32 128, %v1904_v30  ;;  %v1930_v43 = vsub.f32 %v128_v39, %v1923_v41  ;;  %v1932_v45 = vand.u32 4294901760, %v126_v44 }
  0x22   :  { %v240_v12 = vand.u32 4294901760, %v239_v10  ;;  %v424_v22 = vand.u32 4294901760, %v423_v20  ;;  %v430_v27 = vand.u32 4294901760, %v429_v25  ;;  %v1975_v4 = vand.u32 4294901760, %v129_v3 }
  0x23   :  { %v235_v13 = vsub.f32 %v233_v9, %v234_v11  ;;  %301 = vmatpush.xpose.msra.mxu3 %v199_v8  ;;  %200 = vmatpush.xpose.msra.mxu0 %v199_v8  ;;  %v614_v47 = vand.u32 4294901760, %v1930_v43  ;;  %v1938_v48 = vsub.f32 %v126_v44, %v1932_v45  ;;  %vm977_vm9 = vcmask 130048  }
  0x24   :  { %v241_v14 = vsub.f32 %v239_v10, %v240_v12  ;;  %v425_v24 = vsub.f32 %v423_v20, %v424_v22  ;;  %v431_v28 = vsub.f32 %v429_v25, %v430_v27  ;;  %vm1152_vm13 = vcmask 1041408  }
  0x25   :  { %v236_v16 = vand.u32 4294901760, %v235_v13  ;;  %272 = vmatpush.xpose.msra.mxu2 %v239_v10  ;;  %v615_v53 = vsub.f32 %v1930_v43, %v614_v47  ;;  %v620_v54 = vand.u32 4294901760, %v1938_v48  ;;  %vm1103_vm14 = vcmask 130112  }
  0x26   :  { %v242_v17 = vand.u32 4294901760, %v241_v14  ;;  %v426_v26 = vand.u32 4294901760, %v425_v24  ;;  %v432_v29 = vand.u32 4294901760, %v431_v28  ;;  %vm1147_vm15 = vcmask 1045509  }
  0x27   :  { %332 = vmatpush.xpose.msrb.mxu0 %v234_v11  ;;  %237 = vmatpush.xpose.msra.mxu1 %v236_v16  ;;  %v616_v60 = vand.u32 4294901760, %v615_v53  ;;  %v621_v61 = vsub.f32 %v1938_v48, %v620_v54 }
  0x28   :  { %138 = vperm.xlu0 %1617, %v133_v5   ;;  %151 = vperm.xlu1 %1619, %v146_v6  }
  0x29   :  { %388 = vmatpush.xpose.msrb.mxu2 %v387_v19  ;;  %427 = vmatpush.xpose.msrb.mxu3 %v426_v26  ;;  %v622_v2 = vand.u32 4294901760, %v621_v61 }
  0x2b   :  { %336 = vmatpush.xpose.msrb.mxu0 %v240_v12  ;;  %243 = vmatpush.xpose.msra.mxu1 %v242_v17 }
  0x2d   :  { %390 = vmatpush.xpose.msrb.mxu2 %v389_v23  ;;  %433 = vmatpush.xpose.msrb.mxu3 %v432_v29 }
  0x2f   :  { %361 = vmatpush.xpose.msrb.mxu1 %v197_v7  ;;  %v127_v7 = vld [vmem:[#allocation2 + $0x28] sm:$0xff] }
  0x30   :  { %1618 = vset.pattern.permute.xlu0 %v1899_v15  ;;  %1620 = vset.pattern.permute.xlu1 %v1899_v15 }
  0x33   :  { %363 = vmatpush.xpose.msrb.mxu1 %v199_v8  ;;  %v1991_v8 = vand.u32 4294901760, %v127_v7 }
  0x35   :  { %v2001_v11 = vsub.f32 %v127_v7, %v1991_v8 }
  0x37   :  { %v810_v13 = vand.u32 4294901760, %v2001_v11 }
  0x38   :  { %144 = vperm.xlu0 %1618, %v133_v5   ;;  %157 = vperm.xlu1 %1620, %v146_v6   ;;  %v1984_v6 = vsub.f32 %v129_v3, %v1975_v4 }
  0x39   :  { %v811_v17 = vsub.f32 %v2001_v11, %v810_v13 }
  0x3a   :  { %v804_v10 = vand.u32 4294901760, %v1984_v6 }
  0x3b   :  { %v812_v18 = vand.u32 4294901760, %v811_v17 }
  0x3c   :  { %v805_v12 = vsub.f32 %v1984_v6, %v804_v10 }
  0x3e   :  { %v806_v16 = vand.u32 4294901760, %v805_v12 }
  0x40   :  { %1622 = vset.pattern.permute.xlu1 %v1893_v1 }
  0x9a   :  { %v1906_v31 = vpop.permute.xlu0 %138  ;;  %v2015_v14 = vpop.permute.xlu1 %151 }
  0x9b   :  { %vm159_vm0 = vcmp.eq.s32.totalorder %v1904_v30, %v1906_v31  ;;  %vm160_vm1 = vcmp.eq.s32.totalorder %v1919_v36, %v1906_v31  ;;  %vm163_vm4 = vcmp.eq.s32.totalorder %v1904_v30, %v2015_v14  ;;  %vm164_vm6 = vcmp.eq.s32.totalorder %v1919_v36, %v2015_v14 }
  0x9c   :  { %1566 = vmatmul.msk.f32.vlgmr.msra.gmra.mxu1 %vm159_vm0, %v1825_v32  ;;  %v1558_v34 = vsel %vm159_vm0, 1.0, %v1826_v33  ;;  %v1559_v42 = vsel %vm160_vm1, 1.0, %v1826_v33 }
  0x9d   :  { %v202_v35 = vsub.f32 %v1558_v34, %v1558_v34  ;;  %489 = vmatpush.xpose.msra.mxu1 %v387_v19  ;;  %v1934_v46 = vsub.f32 %v1559_v42, %v1559_v42 }
  0x9f   :  { %275 = vmatmul.f32.vlgmr.msra.gmra.mxu2 %v202_v35  ;;  %v203_v37 = vand.u32 4294901760, %v202_v35  ;;  %v393_v51 = vand.u32 4294901760, %v1934_v46 }
  0xa0   :  { %522 = vmatpush.xpose.msra.mxu2 %v424_v22 }
  0xa1   :  { %305 = vmatmul.f32.vlgmr.msra.gmra.mxu3 %v203_v37  ;;  %v204_v38 = vsub.f32 %v202_v35, %v203_v37  ;;  %491 = vmatpush.xpose.msra.mxu1 %v389_v23  ;;  %v394_v57 = vsub.f32 %v1934_v46, %v393_v51 }
  0xa2   :  { %551 = vmatpush.xpose.msra.mxu3 %v387_v19  ;;  %v1562_v19 = vsel %vm163_vm4, 1.0, %v1826_v33 }
  0xa3   :  { %v205_v40 = vand.u32 4294901760, %v204_v38  ;;  %v395_v63 = vand.u32 4294901760, %v394_v57  ;;  %v582_v24 = vsub.f32 %v1562_v19, %v1562_v19 }
  0xa4   :  { %526 = vmatpush.xpose.msra.mxu2 %v430_v27  ;;  %v1563_v27 = vsel %vm164_vm6, 1.0, %v1826_v33 }
  0xa5   :  { %206 = vmatmul.f32.vlgmr.msra.gmra.mxu0 %v205_v40  ;;  %v772_v31 = vsub.f32 %v1563_v27, %v1563_v27 }
  0xa6   :  { %459 = vmatpush.xpose.msra.mxu0 %v423_v20  ;;  %553 = vmatpush.xpose.msra.mxu3 %v389_v23  ;;  %v117_v20 = vld [vmem:[#allocation7] sm:$0x3] }
  0xa7   :  { %v943_v21 = vperm.slane %v117_v20, 0  ;;  %v956_v22 = vperm.slane %v117_v20, 1  ;;  %v773_v37 = vand.u32 4294901760, %v772_v31 }
  0xa9   :  { %948 = vperm.xlu2 %1621, %v943_v21   ;;  %961 = vperm.xlu1 %1622, %v956_v22  }
  0xaa   :  { %v1940_v49 = vpop.permute.xlu0 %144  ;;  %462 = vmatpush.xpose.msra.mxu0 %v429_v25  ;;  %v2036_v23 = vpop.permute.xlu1 %157  ;;  %v583_v25 = vand.u32 4294901760, %v582_v24 }
  0xab   :  { %vm161_vm2 = vcmp.eq.s32.totalorder %v1904_v30, %v1940_v49  ;;  %vm162_vm3 = vcmp.eq.s32.totalorder %v1919_v36, %v1940_v49  ;;  %vm165_vm5 = vcmp.eq.s32.totalorder %v1904_v30, %v2036_v23  ;;  %vm166_vm7 = vcmp.eq.s32.totalorder %v1919_v36, %v2036_v23 }
  0xac   :  { %1567 = vmatmul.msk.f32.gmra.mxu1 %vm161_vm2, %v1825_v32  ;;  %v1560_v50 = vsel %vm161_vm2, 1.0, %v1826_v33  ;;  %v1561_v55 = vsel %vm162_vm3, 1.0, %v1826_v33  ;;  %v1564_v26 = vsel %vm165_vm5, 1.0, %v1826_v33  ;;  %v584_v28 = vsub.f32 %v582_v24, %v583_v25 }
  0xad   :  { %v210_v52 = vsub.f32 %v1560_v50, %v1560_v50  ;;  %v1964_v58 = vsub.f32 %v1561_v55, %v1561_v55  ;;  %v590_v29 = vsub.f32 %v1564_v26, %v1564_v26  ;;  %v1565_v38 = vsel %vm166_vm7, 1.0, %v1826_v33 }
  0xae   :  { %v585_v34 = vand.u32 4294901760, %v584_v28  ;;  %v780_v40 = vsub.f32 %v1565_v38, %v1565_v38 }
  0xaf   :  { %280 = vmatmul.f32.gmra.mxu2 %v210_v52  ;;  %v211_v56 = vand.u32 4294901760, %v210_v52  ;;  %v401_v0 = vand.u32 4294901760, %v1964_v58  ;;  %v591_v35 = vand.u32 4294901760, %v590_v29 }
  0xb0   :  { %v781_v44 = vand.u32 4294901760, %v780_v40 }
  0xb1   :  { %311 = vmatmul.f32.gmra.mxu3 %v211_v56  ;;  %v212_v59 = vsub.f32 %v210_v52, %v211_v56  ;;  %v402_v5 = vsub.f32 %v1964_v58, %v401_v0  ;;  %1623 = vset.pattern.permute.xlu2 %v1899_v15  ;;  %v592_v39 = vsub.f32 %v590_v29, %v591_v35 }
  0xb3   :  { %v213_v62 = vand.u32 4294901760, %v212_v59  ;;  %v403_v9 = vand.u32 4294901760, %v402_v5  ;;  %v593_v42 = vand.u32 4294901760, %v592_v39 }
  0xb4   :  { %1570 = vmatmul.msk.f32.vlgmr.msrb.gmra.mxu1 %vm159_vm0, %v1825_v32 }
  0xb5   :  { %214 = vmatmul.f32.gmra.mxu0 %v213_v62  ;;  %617 = vmatpush.xpose.msrb.mxu1 %v616_v60 }
  0xb7   :  { %396 = vmatmul.f32.vlgmr.msrb.gmra.mxu2 %v395_v63 }
  0xb8   :  { %649 = vmatpush.xpose.msrb.mxu2 %v1930_v43 }
  0xb9   :  { %1572 = vmatmul.msk.f32.vlgmr.msrb.gmra.mxu3 %vm160_vm1, %v1825_v32  ;;  %623 = vmatpush.xpose.msrb.mxu1 %v622_v2 }
  0xba   :  { %679 = vmatpush.xpose.msrb.mxu3 %v1923_v41  ;;  %954 = vperm.xlu2 %1623, %v943_v21  }
  0xbc   :  { %1571 = vmatmul.msk.f32.gmra.mxu1 %vm161_vm2, %v1825_v32  ;;  %652 = vmatpush.xpose.msrb.mxu2 %v1938_v48 }
  0xbd   :  { %1568 = vmatmul.msk.f32.vlgmr.msrb.gmra.mxu0 %vm159_vm0, %v1825_v32  ;;  %vm1154_vm0 = vcmask 1043456  }
  0xbe   :  { %578 = vmatpush.xpose.msrb.mxu0 %v1923_v41  ;;  %681 = vmatpush.xpose.msrb.mxu3 %v1932_v45 }
  0xbf   :  { %404 = vmatmul.f32.gmra.mxu2 %v403_v9 }
  0xc1   :  { %1573 = vmatmul.msk.f32.gmra.mxu3 %vm162_vm3, %v1825_v32 }
  0xc2   :  { %580 = vmatpush.xpose.msrb.mxu0 %v1932_v45  ;;  %967 = vperm.xlu2 %1623, %v956_v22  }
  0xc4   :  { %495 = vmatmul.f32.vlgmr.msra.gmra.mxu1 %v393_v51 }
  0xc5   :  { %1569 = vmatmul.msk.f32.gmra.mxu0 %vm161_vm2, %v1825_v32  ;;  %741 = vmatpush.xpose.msra.mxu1 %v1923_v41  ;;  %v774_v41 = vsub.f32 %v772_v31, %v773_v37 }
  0xc7   :  { %1574 = vmatmul.msk.f32.vlgmr.msra.gmra.mxu2 %vm160_vm1, %v1825_v32  ;;  %v775_v43 = vand.u32 4294901760, %v774_v41 }
  0xc8   :  { %768 = vmatpush.xpose.msra.mxu2 %v1975_v4 }
  0xc9   :  { %1576 = vmatmul.msk.f32.vlgmr.msra.gmra.mxu3 %vm160_vm1, %v1825_v32  ;;  %743 = vmatpush.xpose.msra.mxu1 %v1932_v45  ;;  %v782_v45 = vsub.f32 %v780_v40, %v781_v44  ;;  %vm1156_vm1 = vcmask 1045504  }
  0xca   :  { %807 = vmatpush.xpose.msra.mxu3 %v806_v16 }
  0xcc   :  { %501 = vmatmul.f32.gmra.mxu1 %v401_v0  ;;  %770 = vmatpush.xpose.msra.mxu2 %v1991_v8 }
  0xcd   :  { %465 = vmatmul.f32.vlgmr.msra.gmra.mxu0 %v1934_v46  ;;  %v783_v46 = vand.u32 4294901760, %v782_v45 }
  0xce   :  { %712 = vmatpush.xpose.msra.mxu0 %v614_v47  ;;  %813 = vmatpush.xpose.msra.mxu3 %v812_v18 }
  0xcf   :  { %1575 = vmatmul.msk.f32.gmra.mxu2 %vm162_vm3, %v1825_v32 }
  0xd1   :  { %1577 = vmatmul.msk.f32.gmra.mxu3 %vm162_vm3, %v1825_v32 }
  0xd2   :  { %716 = vmatpush.xpose.msra.mxu0 %v620_v54 }
  0xd4   :  { %1578 = vmatmul.msk.f32.vlgmr.msrb.gmra.mxu1 %vm163_vm4, %v1825_v32 }
  0xd5   :  { %470 = vmatmul.f32.gmra.mxu0 %v1964_v58  ;;  %869 = vmatpush.xpose.msrb.mxu1 %v1975_v4 }
  0xd7   :  { %655 = vmatmul.f32.vlgmr.msrb.gmra.mxu2 %v582_v24 }
  0xd8   :  { %902 = vmatpush.xpose.msrb.mxu2 %v804_v10 }
  0xd9   :  { %685 = vmatmul.f32.vlgmr.msrb.gmra.mxu3 %v583_v25  ;;  %871 = vmatpush.xpose.msrb.mxu1 %v1991_v8 }
  0xda   :  { %931 = vmatpush.xpose.msrb.mxu3 %v1975_v4 }
  0xdc   :  { %1579 = vmatmul.msk.f32.gmra.mxu1 %vm165_vm5, %v1825_v32  ;;  %906 = vmatpush.xpose.msrb.mxu2 %v810_v13 }
  0xdd   :  { %586 = vmatmul.f32.vlgmr.msrb.gmra.mxu0 %v585_v34 }
  0xde   :  { %839 = vmatpush.xpose.msrb.mxu0 %v1984_v6  ;;  %933 = vmatpush.xpose.msrb.mxu3 %v1991_v8 }
  0xdf   :  { %660 = vmatmul.f32.gmra.mxu2 %v590_v29 }
  0xe1   :  { %691 = vmatmul.f32.gmra.mxu3 %v591_v35 }
  0xe2   :  { %842 = vmatpush.xpose.msrb.mxu0 %v2001_v11 }
  0xe4   :  { %1582 = vmatmul.msk.f32.vlgmr.msra.gmra.mxu1 %vm163_vm4, %v1825_v32 }
  0xe5   :  { %594 = vmatmul.f32.gmra.mxu0 %v593_v42 }
  0xe7   :  { %776 = vmatmul.f32.vlgmr.msra.gmra.mxu2 %v775_v43 }
  0xe9   :  { %1584 = vmatmul.msk.f32.vlgmr.msra.gmra.mxu3 %vm164_vm6, %v1825_v32 }
  0xec   :  { %1583 = vmatmul.msk.f32.gmra.mxu1 %vm165_vm5, %v1825_v32 }
  0xed   :  { %1580 = vmatmul.msk.f32.vlgmr.msra.gmra.mxu0 %vm163_vm4, %v1825_v32 }
  0xef   :  { %784 = vmatmul.f32.gmra.mxu2 %v783_v46 }
  0xf1   :  { %1585 = vmatmul.msk.f32.gmra.mxu3 %vm166_vm7, %v1825_v32 }
  0xf4   :  { %875 = vmatmul.f32.vlgmr.msrb.gmra.mxu1 %v773_v37 }
  0xf5   :  { %1581 = vmatmul.msk.f32.gmra.mxu0 %vm165_vm5, %v1825_v32  ;;  %vm1373_vm5 = vcmask 93184  }
  0xf7   :  { %1586 = vmatmul.msk.f32.vlgmr.msrb.gmra.mxu2 %vm164_vm6, %v1825_v32 }
  0xf9   :  { %1588 = vmatmul.msk.f32.vlgmr.msrb.gmra.mxu3 %vm164_vm6, %v1825_v32 }
  0xfc   :  { %881 = vmatmul.f32.gmra.mxu1 %v781_v44 }
  0xfd   :  { %845 = vmatmul.f32.vlgmr.msrb.gmra.mxu0 %v772_v31 }
  0xff   :  { %1587 = vmatmul.msk.f32.gmra.mxu2 %vm166_vm7, %v1825_v32 }
 0x101   :  { %1589 = vmatmul.msk.f32.gmra.mxu3 %vm166_vm7, %v1825_v32 }
 0x103   :  { %v949_v16 = vpop.permute.xlu2 %948 }
 0x104   :  { %vm969_vm8 = vcmp.eq.s32.totalorder %v1904_v30, %v949_v16 }
 0x105   :  { %850 = vmatmul.f32.gmra.mxu0 %v780_v40 }
 0x114   :  { %v955_v34 = vpop.permute.xlu2 %954 }
 0x115   :  { %vm970_vm10 = vcmp.eq.s32.totalorder %v1904_v30, %v955_v34 }
 0x119   :  { %v246_v47 = vpop.f32.mrf.mxu1 }
 0x122   :  { %v207_v49 = vpop.f32.mrf.mxu0  ;;  %v276_v50 = vpop.f32.mrf.mxu2 }
 0x123   :  { %v247_v55 = vadd.f32 %v246_v47, %v207_v49 }
 0x124   :  { %v306_v51 = vpop.f32.mrf.mxu3 }
 0x125   :  { %v277_v57 = vadd.f32 %v276_v50, %v247_v55 }
 0x127   :  { %v307_v61 = vadd.f32 %v306_v51, %v277_v57 }
 0x129   :  { %v250_v48 = vpop.f32.mrf.mxu1 }
 0x131   :  { %v366_v52 = vpop.f32.mrf.mxu1 }
 0x132   :  { %v215_v53 = vpop.f32.mrf.mxu0  ;;  %v281_v54 = vpop.f32.mrf.mxu2 }
 0x133   :  { %v251_v62 = vadd.f32 %v250_v48, %v215_v53 }
 0x134   :  { %v312_v56 = vpop.f32.mrf.mxu3 }
 0x135   :  { %v282_v32 = vadd.f32 %v281_v54, %v251_v62 }
 0x137   :  { %v313_v5 = vadd.f32 %v312_v56, %v282_v32 }
 0x139   :  { %v370_v58 = vpop.f32.mrf.mxu1 }
 0x13a   :  { %v339_v59 = vpop.f32.mrf.mxu0  ;;  %v397_v60 = vpop.f32.mrf.mxu2 }
 0x13b   :  { %v340_v36 = vadd.f32 %v339_v59, %v307_v61 }
 0x13c   :  { %v436_v63 = vpop.f32.mrf.mxu3 }
 0x13d   :  { %v367_v0 = vadd.f32 %v366_v52, %v340_v36 }
 0x13f   :  { %v398_v7 = vadd.f32 %v397_v60, %v367_v0 }
 0x141   :  { %v496_v2 = vpop.f32.mrf.mxu1  ;;  %v437_v9 = vadd.f32 %v436_v63, %v398_v7 }
 0x142   :  { %v343_v3 = vpop.f32.mrf.mxu0  ;;  %v405_v4 = vpop.f32.mrf.mxu2 }
 0x143   :  { %v344_v8 = vadd.f32 %v343_v3, %v313_v5 }
 0x144   :  { %v440_v6 = vpop.f32.mrf.mxu3 }
 0x145   :  { %v371_v10 = vadd.f32 %v370_v58, %v344_v8  ;;  %v962_v8 = vpop.permute.xlu1 %961 }
 0x146   :  { %vm971_vm11 = vcmp.eq.s32.totalorder %v1904_v30, %v962_v8 }
 0x147   :  { %v406_v18 = vadd.f32 %v405_v4, %v371_v10 }
 0x149   :  { %v502_v11 = vpop.f32.mrf.mxu1  ;;  %v441_v21 = vadd.f32 %v440_v6, %v406_v18 }
 0x14a   :  { %v466_v12 = vpop.f32.mrf.mxu0  ;;  %v529_v13 = vpop.f32.mrf.mxu2 }
 0x14b   :  { %v467_v14 = vadd.f32 %v466_v12, %v437_v9 }
 0x14c   :  { %v556_v17 = vpop.f32.mrf.mxu3 }
 0x14d   :  { %v497_v19 = vadd.f32 %v496_v2, %v467_v14 }
 0x14f   :  { %v530_v20 = vadd.f32 %v529_v13, %v497_v19 }
 0x151   :  { %v557_v22 = vadd.f32 %v556_v17, %v530_v20  ;;  %v626_v23 = vpop.f32.mrf.mxu1 }
 0x152   :  { %v471_v24 = vpop.f32.mrf.mxu0  ;;  %v533_v25 = vpop.f32.mrf.mxu2 }
 0x153   :  { %v472_v26 = vadd.f32 %v471_v24, %v441_v21  ;;  %v973_v27 = vsel %vm969_vm8, %v557_v22, 0.0  ;;  %v968_v21 = vpop.permute.xlu2 %967 }
 0x154   :  { %v560_v28 = vpop.f32.mrf.mxu3  ;;  %v978_v29 = vsel %vm977_vm9, %v973_v27, 0.0  ;;  %vm972_vm12 = vcmp.eq.s32.totalorder %v1904_v30, %v968_v21  ;;  %v2132_v27 = vld [vmem:[#allocation8] sm:$0x3] }
 0x155   :  { %v503_v31 = vadd.f32 %v502_v11, %v472_v26  ;;  %979 = vadd.xlane.f32.xlu0 %v978_v29  ;;  %v1133_v29 = vld [vmem:[#allocation11 + $0x8] sm:$0xff] }
 0x157   :  { %v534_v35 = vadd.f32 %v533_v25, %v503_v31  ;;  %v1175_v31 = vand.u32 4294901760, %v1133_v29 }
 0x159   :  { %v561_v37 = vadd.f32 %v560_v28, %v534_v35  ;;  %v630_v41 = vpop.f32.mrf.mxu1  ;;  %v991_v28 = vperm.slane %v2132_v27, 0  ;;  %v1203_v34 = vsub.f32 %v1133_v29, %v1175_v31  ;;  %1176 = vmatpush.msra.mxu0 %v1175_v31  ;;  %1260 = vmatpush.msra.mxu3 %v1175_v31  ;;  %v1132_v35 = vld [vmem:[#allocation11] sm:$0xff] }
 0x15a   :  { %v587_v38 = vpop.f32.mrf.mxu0  ;;  %v656_v39 = vpop.f32.mrf.mxu2 }
 0x15b   :  { %v974_v40 = vsel %vm970_vm10, %v561_v37, 0.0  ;;  %v627_v46 = vadd.f32 %v626_v23, %v587_v38  ;;  %1235 = vmatpush.msra.mxu2 %v1203_v34  ;;  %v1177_v37 = vand.u32 4294901760, %v1132_v35  ;;  %v1204_v38 = vand.u32 4294901760, %v1203_v34 }
 0x15c   :  { %v686_v42 = vpop.f32.mrf.mxu3  ;;  %v981_v43 = vsel %vm977_vm9, %v974_v40, 0.0 }
 0x15d   :  { %982 = vadd.xlane.f32.xlu1 %v981_v43  ;;  %v657_v49 = vadd.f32 %v656_v39, %v627_v46  ;;  %v1209_v39 = vsub.f32 %v1132_v35, %v1177_v37  ;;  %1178 = vmatpush.msra.mxu0 %v1177_v37  ;;  %v1205_v40 = vsub.f32 %v1203_v34, %v1204_v38  ;;  %v2140_v46 = vadd.s32 4294967288, %v1904_v30  ;;  %v2181_v34 = vld [vmem:[#allocation11 + $0x18] sm:$0xf] }
 0x15e   :  { %1262 = vmatpush.msra.mxu3 %v1177_v37 }
 0x15f   :  { %v687_v52 = vadd.f32 %v686_v42, %v657_v49  ;;  %1238 = vmatpush.msra.mxu2 %v1209_v39  ;;  %1287 = vmatpush.msrb.mxu0 %v1204_v38  ;;  %v1206_v42 = vand.u32 4294901760, %v1205_v40 }
 0x161   :  { %v746_v48 = vpop.f32.mrf.mxu1  ;;  %1207 = vmatpush.msra.mxu1 %v1206_v42 }
 0x162   :  { %v595_v44 = vpop.f32.mrf.mxu0  ;;  %v661_v45 = vpop.f32.mrf.mxu2 }
 0x163   :  { %v631_v53 = vadd.f32 %v630_v41, %v595_v44  ;;  %v1210_v41 = vand.u32 4294901760, %v1209_v39 }
 0x164   :  { %v692_v47 = vpop.f32.mrf.mxu3 }
 0x165   :  { %v662_v56 = vadd.f32 %v661_v45, %v631_v53  ;;  %v1211_v43 = vsub.f32 %v1209_v39, %v1210_v41  ;;  %1291 = vmatpush.msrb.mxu0 %v1210_v41 }
 0x167   :  { %v693_v61 = vadd.f32 %v692_v47, %v662_v56  ;;  %v1212_v44 = vand.u32 4294901760, %v1211_v43  ;;  %v121_v47 = vld [vmem:[#allocation10] sm:$0x3] }
 0x169   :  { %v750_v57 = vpop.f32.mrf.mxu1  ;;  %1213 = vmatpush.msra.mxu1 %v1212_v44 }
 0x16a   :  { %v719_v50 = vpop.f32.mrf.mxu0  ;;  %v777_v51 = vpop.f32.mrf.mxu2 }
 0x16b   :  { %v720_v55 = vadd.f32 %v719_v50, %v687_v52  ;;  %1312 = vmatpush.msrb.mxu1 %v1175_v31  ;;  %v1135_v50 = vrot.slane %v121_v47, 6  ;;  %v120_v52 = vld [vmem:[%s2254_s5] sm:$0x3]  ;;  %s1827_s5 = smov 116  }
 0x16c   :  { %v816_v54 = vpop.f32.mrf.mxu3 }
 0x16d   :  { %v747_v58 = vadd.f32 %v746_v48, %v720_v55  ;;  %1314 = vmatpush.msrb.mxu1 %v1177_v37 }
 0x16f   :  { %v778_v63 = vadd.f32 %v777_v51, %v747_v58  ;;  %v1153_v58 = vsel %vm1152_vm13, %v120_v52, %v1135_v50 }
 0x171   :  { %v817_v32 = vadd.f32 %v816_v54, %v778_v63  ;;  %v876_v2 = vpop.f32.mrf.mxu1 }
 0x172   :  { %v723_v59 = vpop.f32.mrf.mxu0  ;;  %v785_v60 = vpop.f32.mrf.mxu2 }
 0x173   :  { %v724_v36 = vadd.f32 %v723_v59, %v693_v61 }
 0x174   :  { %v820_v62 = vpop.f32.mrf.mxu3 }
 0x175   :  { %v751_v0 = vadd.f32 %v750_v57, %v724_v36  ;;  %v1150_v57 = vrot.slane %v2132_v27, 2 }
 0x177   :  { %v786_v6 = vadd.f32 %v785_v60, %v751_v0 }
 0x179   :  { %v821_v11 = vadd.f32 %v820_v62, %v786_v6  ;;  %v882_v17 = vpop.f32.mrf.mxu1 }
 0x17a   :  { %v846_v3 = vpop.f32.mrf.mxu0  ;;  %v909_v5 = vpop.f32.mrf.mxu2 }
 0x17b   :  { %v847_v4 = vadd.f32 %v846_v3, %v817_v32 }
 0x17c   :  { %v936_v9 = vpop.f32.mrf.mxu3 }
 0x17d   :  { %v877_v7 = vadd.f32 %v876_v2, %v847_v4 }
 0x17f   :  { %v910_v10 = vadd.f32 %v909_v5, %v877_v7 }
 0x181   :  { %v937_v12 = vadd.f32 %v936_v9, %v910_v10 }
 0x182   :  { %v851_v13 = vpop.f32.mrf.mxu0  ;;  %v913_v20 = vpop.f32.mrf.mxu2 }
 0x183   :  { %v852_v14 = vadd.f32 %v851_v13, %v821_v11  ;;  %v975_v16 = vsel %vm971_vm11, %v937_v12, 0.0 }
 0x184   :  { %v984_v18 = vsel %vm977_vm9, %v975_v16, 0.0  ;;  %v940_v23 = vpop.f32.mrf.mxu3 }
 0x185   :  { %v883_v19 = vadd.f32 %v882_v17, %v852_v14  ;;  %985 = vadd.xlane.f32.xlu2 %v984_v18  ;;  %v1828_v17 = vmov 0  }
 0x187   :  { %v914_v22 = vadd.f32 %v913_v20, %v883_v19  ;;  %v1004_v19 = vperm.slane %v2132_v27, 1  ;;  %v2173_v20 = vld [vmem:[%s2252_s3] sm:$0x3] }
 0x188   :  { %v1026_v21 = vperm.slane %v2173_v20, 0 }
 0x189   :  { %v941_v24 = vadd.f32 %v940_v23, %v914_v22  ;;  %v1039_v22 = vperm.slane %v2173_v20, 1 }
 0x18b   :  { %v976_v25 = vsel %vm972_vm12, %v941_v24, 0.0  ;;  %vm1469_vm12 = vcmask 1047559  }
 0x18c   :  { %v987_v26 = vsel %vm977_vm9, %v976_v25, 0.0 }
 0x18d   :  { %988 = vadd.xlane.f32.xlu2 %v987_v26 }
 0x1a5   :  { %1002 = vperm.xlu2 %1623, %v991_v28  }
 0x1c8   :  { %v2144_v49 = vpop.xlane.xlu0 %979 }
 0x1c9   :  { %v1141_v54 = vperm.slane %v2144_v49, %v1904_v30 }
 0x1d0   :  { %v2142_v48 = vpop.xlane.xlu1 %982 }
 0x1d1   :  { %v1142_v51 = vperm.slane %v2142_v48, %v2140_v46 }
 0x1d3   :  { %v1143_v59 = vsel %vm1103_vm14, %v1142_v51, %v1141_v54 }
 0x1f8   :  { %v2137_v45 = vpop.xlane.xlu2 %985 }
 0x1f9   :  { %v1144_v55 = vperm.slane %v2137_v45, %v1904_v30 }
 0x200   :  { %v2151_v53 = vpop.xlane.xlu2 %988 }
 0x201   :  { %v1145_v56 = vperm.slane %v2151_v53, %v2140_v46 }
 0x203   :  { %v1146_v60 = vsel %vm1103_vm14, %v1145_v56, %v1144_v55  ;;  %v1628_v56 = vld [vmem:[#allocation11 + $0x10] ss:$0 sm:$0xff] }
 0x204   :  { %v1148_v61 = vsel %vm1147_vm15, %v1146_v60, %v1143_v59 }
 0x205   :  { %v1155_v62 = vsel %vm1154_vm0, %v1153_v58, %v1148_v61 }
 0x206   :  { %v1157_v63 = vsel %vm1156_vm1, %v1155_v62, %v1150_v57 }
 0x207   :  { %v1159_v36 = vsel %vm977_vm9, %v1157_v63, 0  ;;  %vm1111_vm9 = vcmask 123904  }
 0x208   :  { %v1179_v32 = vand.u32 4294901760, %v1159_v36 }
 0x20a   :  { %1215 = vmatmul.f32.vlgmr.msra.gmra.mxu1 %v1179_v32  ;;  %v1180_v0 = vsub.f32 %v1159_v36, %v1179_v32 }
 0x20c   :  { %1241 = vmatmul.f32.vlgmr.msra.gmra.mxu2 %v1180_v0  ;;  %v1181_v2 = vand.u32 4294901760, %v1180_v0 }
 0x20e   :  { %1266 = vmatmul.f32.vlgmr.msra.gmra.mxu3 %v1181_v2  ;;  %v1182_v3 = vsub.f32 %v1180_v0, %v1181_v2 }
 0x210   :  { %v1183_v4 = vand.u32 4294901760, %v1182_v3 }
 0x212   :  { %1184 = vmatmul.f32.vlgmr.msra.gmra.mxu0 %v1183_v4  ;;  %1316 = vmatmul.f32.vlgmr.msrb.gmra.mxu1 %v1179_v32 }
 0x21a   :  { %1293 = vmatmul.f32.vlgmr.msrb.gmra.mxu0 %v1179_v32 }
 0x287   :  { %v1216_v5 = vpop.f32.mrf.mxu1 }
 0x28f   :  { %v1185_v6 = vpop.f32.mrf.mxu0  ;;  %v1242_v8 = vpop.f32.mrf.mxu2 }
 0x290   :  { %v1217_v7 = vadd.f32 %v1216_v5, %v1185_v6  ;;  %v1317_v14 = vpop.f32.mrf.mxu1 }
 0x291   :  { %v1267_v10 = vpop.f32.mrf.mxu3 }
 0x292   :  { %v1243_v9 = vadd.f32 %v1242_v8, %v1217_v7 }
 0x294   :  { %v1268_v11 = vadd.f32 %v1267_v10, %v1243_v9 }
 0x297   :  { %v1294_v12 = vpop.f32.mrf.mxu0 }
 0x298   :  { %v1295_v13 = vadd.f32 %v1294_v12, %v1268_v11 }
 0x29a   :  { %v1318_v16 = vadd.f32 %v1317_v14, %v1295_v13 }
 0x29c   :  { %1331 = vrot.lane.b32.xlu0 %v1318_v16, %s1827_s5  ;;  %vm1322_vm2 = vcmp.gt.f32.partialorder %v1318_v16, 0.5 }
 0x29d   :  { %v1323_v18 = vsel %vm1322_vm2, 1, %v1828_v17 }
 0x29e   :  { %1324 = vrot.lane.b32.xlu1 %v1323_v18, %s1827_s5 }
 0x2a6   :  { %996 = vperm.xlu1 %1622, %v991_v28  }
 0x2ae   :  { %1009 = vperm.xlu1 %1622, %v1004_v19  }
 0x2b6   :  { %1624 = vset.pattern.permute.xlu1 %v1899_v15 }
 0x2be   :  { %1015 = vperm.xlu1 %1624, %v1004_v19  }
 0x2c6   :  { %1625 = vset.pattern.permute.xlu1 %v1893_v1 }
 0x2ce   :  { %1031 = vperm.xlu1 %1625, %v1026_v21  }
 0x2d6   :  { %1044 = vperm.xlu1 %1625, %v1039_v22  }
 0x30e   :  { %v1332_v23 = vpop.permute.xlu0 %1331 }
 0x30f   :  { %v1334_v24 = vsub.f32 %v1318_v16, %v1332_v23 }
 0x310   :  { %v1325_v25 = vpop.permute.xlu1 %1324 }
 0x311   :  { %v1335_v15 = vmul.f32 %v1334_v24, %v1334_v24  ;;  %vm1326_vm3 = vcmp.ne.s32.totalorder %v1325_v25, 0  ;;  %v2204_v24 = vpop.permute.xlu2 %1002 }
 0x312   :  { %vm1327_vm4 = vmand %vm1322_vm2, %vm1326_vm3 }
 0x313   :  { %v1337_v26 = vrot.slane %v1335_v15, 2  ;;  %v1594_v27 = vsel %vm1327_vm4, 1.0, %v1826_v33  ;;  %v1340_v29 = vrot.slane %v1335_v15, 4 }
 0x314   :  { %1362 = vst [vmem:[#allocation1] sm:$0xff] %v1594_v27  ;;  %v1356_v61 = vmul.f32 %v1628_v56, %v1594_v27 }
 0x315   :  { %v1339_v28 = vadd.f32 %v1337_v26, %v1335_v15 }
 0x317   :  { %v1342_v31 = vadd.f32 %v1340_v29, %v1339_v28 }
 0x318   :  { %v997_v63 = vpop.permute.xlu1 %996 }
 0x319   :  { %1629 = vrsqrt.f32 %v1342_v31  ;;  %vm1350_vm6 = vcmp.eq.f32.partialorder %v1342_v31, inf  ;;  %v1353_v57 = vand.u32 2147483648, %v1342_v31  ;;  %vm1352_vm7 = vcmp.eq.f32.partialorder %v1342_v31, 0.0 }
 0x31a   :  { %v1021_v10 = vsub.f32 %v2144_v49, %v997_v63  ;;  %v1122_v49 = vsel %vm1111_vm9, %v2173_v20, 0.0 }
 0x31b   :  { %v1364_v35 = vld [vmem:[#allocation1 + $0x6] ss:$9 sm:$0xff] }
 0x31c   :  { %v1367_v37 = vperm.slane %v1364_v35, 0  ;;  %v1366_v38 = vld [vmem:[#allocation1 + $0x7] ss:$9 sm:$0xff] }
 0x31d   :  { %v1368_v43 = vperm.slane %v1366_v38, 0 }
 0x31e   :  { %v1371_v39 = vmul.f32 %v1367_v37, %v2181_v34 }
 0x31f   :  { %v1630_v40 = vpop.eup %1629  ;;  %v1372_v50 = vmul.f32 %v1368_v43, %v2181_v34 }
 0x320   :  { %v1344_v41 = vmul.f32 %v1630_v40, %v1342_v31  ;;  %v1374_v42 = vsel %vm1373_vm5, %v1371_v39, 0.0  ;;  %v1010_v3 = vpop.permute.xlu1 %1009 }
 0x321   :  { %1375 = vadd.xlane.f32.xlu2 %v1374_v42  ;;  %v1377_v54 = vsel %vm1373_vm5, %v1372_v50, 0.0 }
 0x322   :  { %v1345_v44 = vmul.f32 %v1630_v40, %v1344_v41 }
 0x324   :  { %v1346_v47 = vmul.f32 0.5, %v1345_v44 }
 0x326   :  { %v1347_v51 = vsub.f32 1.5, %v1346_v47 }
 0x328   :  { %v1348_v52 = vmul.f32 %v1630_v40, %v1347_v51 }
 0x329   :  { %1378 = vadd.xlane.f32.xlu2 %v1377_v54 }
 0x32a   :  { %v1349_v55 = vmul.f32 %v1348_v52, %v1342_v31 }
 0x32c   :  { %v1351_v58 = vsel %vm1350_vm6, %v1342_v31, %v1349_v55 }
 0x32d   :  { %v1354_v59 = vsel %vm1352_vm7, %v1353_v57, %v1351_v58 }
 0x32e   :  { %v1358_v60 = vrot.slane %v1354_v59, 2 }
 0x330   :  { %v2187_v62 = vmul.f32 %v1358_v60, %v1356_v61  ;;  %v2194_v8 = vpop.permute.xlu1 %1015 }
 0x332   :  { %1381 = vst [vmem:[#allocation1] sm:$0xff] %v2187_v62 }
 0x339   :  { %v1385_v36 = vld [vmem:[#allocation1 + $0x7] ss:$9 sm:$0xff] }
 0x33a   :  { %v1383_v32 = vld [vmem:[#allocation1 + $0x6] ss:$9 sm:$0xff]  ;;  %v1387_v0 = vperm.slane %v1385_v36, 0 }
 0x33b   :  { %v1386_v2 = vperm.slane %v1383_v32, 0 }
 0x33c   :  { %v1391_v4 = vmul.f32 %v1387_v0, %v2181_v34 }
 0x33d   :  { %v1390_v5 = vmul.f32 %v1386_v2, %v2181_v34 }
 0x33e   :  { %v1395_v6 = vsel %vm1373_vm5, %v1391_v4, 0.0 }
 0x33f   :  { %v1392_v7 = vsel %vm1373_vm5, %v1390_v5, 0.0  ;;  %1396 = vadd.xlane.f32.xlu2 %v1395_v6 }
 0x340   :  { %1393 = vadd.xlane.f32.xlu0 %v1392_v7  ;;  %v1032_v9 = vpop.permute.xlu1 %1031 }
 0x341   :  { %v1056_v11 = vmul.f32 %v1032_v9, %v1021_v10 }
 0x343   :  { %v1060_v12 = vand.u32 2147483647, %v1056_v11  ;;  %v1068_v13 = vmul.f32 0.5, %v1056_v11 }
 0x345   :  { %v1072_v14 = vmul.f32 %v1068_v13, %v1056_v11  ;;  %v1590_v16 = vadd.f32 -0.5, %v1060_v12  ;;  %vm1064_vm8 = vcmp.lt.f32.partialorder %v1060_v12, 1.0 }
 0x347   :  { %v1080_v18 = vsel %vm1064_vm8, %v1072_v14, %v1590_v16 }
 0x348   :  { %v1045_v19 = vpop.permute.xlu1 %1044 }
 0x354   :  { %1050 = vperm.xlu0 %1618, %v1039_v22   ;;  %v1023_v22 = vsub.f32 %v2137_v45, %v1010_v3 }
 0x356   :  { %v1058_v23 = vmul.f32 %v1045_v19, %v1023_v22 }
 0x357   :  { %1037 = vperm.xlu2 %1623, %v1026_v21  }
 0x358   :  { %v1062_v21 = vand.u32 2147483647, %v1058_v23  ;;  %v1070_v25 = vmul.f32 0.5, %v1058_v23 }
 0x35a   :  { %v1074_v15 = vmul.f32 %v1070_v25, %v1058_v23  ;;  %v1592_v26 = vadd.f32 -0.5, %v1062_v21  ;;  %vm1066_vm10 = vcmp.lt.f32.partialorder %v1062_v21, 1.0 }
 0x35c   :  { %1626 = vset.pattern.permute.xlu0 %v1828_v17  ;;  %v1082_v29 = vsel %vm1066_vm10, %v1074_v15, %v1592_v26 }
 0x35d   :  { %1089 = vperm.xlu0 %1626, %v1080_v18  }
 0x35f   :  { %1627 = vset.pattern.permute.xlu2 %v1828_v17 }
 0x380   :  { %1123 = vadd.xlane.f32.xlu2 %v1122_v49 }
 0x394   :  { %v2206_v27 = vpop.xlane.xlu2 %1375 }
 0x395   :  { %v1400_v17 = vmax.f32 %v2206_v27, 1.0  ;;  %v1450_v28 = vmul.f32 %v2206_v27, %v2181_v34  ;;  %vm1398_vm7 = vcmp.gt.f32.partialorder %v2206_v27, 0.5 }
 0x397   :  { %1631 = vrcp.f32 %v1400_v17  ;;  %v1452_v20 = vsel %vm1373_vm5, %v1450_v28, 0.0  ;;  %vm1407_vm15 = vweird.f32 %v1400_v17  ;;  %v1413_v32 = vand.u32 2147483648, %v1400_v17 }
 0x398   :  { %v1453_v45 = vrot.slane %v1452_v20, 4  ;;  %1095 = vperm.xlu2 %1627, %v1082_v29   ;;  %v1411_v6 = vand.u32 2147483647, %v1400_v17 }
 0x399   :  { %v1414_v12 = vor.u32 1.1754944e-38, %v1413_v32 }
 0x39a   :  { %v1454_v31 = vadd.f32 %v1453_v45, %v1452_v20  ;;  %vm1412_vm4 = vcmp.eq.f32.partialorder %v1411_v6, 8.507059e+37  ;;  %v1022_v20 = vsub.f32 %v2142_v48, %v2204_v24 }
 0x39c   :  { %v1455_v35 = vrot.slane %v1454_v31, 2  ;;  %v1379_v37 = vpop.xlane.xlu2 %1378 }
 0x39d   :  { %v1632_v38 = vpop.eup %1631  ;;  %v1401_v39 = vmax.f32 %v1379_v37, 1.0  ;;  %v1451_v40 = vmul.f32 %v1379_v37, %v2181_v34  ;;  %vm1399_vm6 = vcmp.gt.f32.partialorder %v1379_v37, 0.5 }
 0x39e   :  { %v1403_v42 = vmul.f32 %v1632_v38, %v1400_v17  ;;  %v1456_v43 = vadd.f32 %v1455_v35, %v1454_v31  ;;  %vm1408_vm11 = vweird.f32 %v1632_v38 }
 0x39f   :  { %1633 = vrcp.f32 %v1401_v39  ;;  %v1459_v41 = vsel %vm1373_vm5, %v1451_v40, 0.0  ;;  %v1428_v4 = vand.u32 2147483648, %v1401_v39  ;;  %vm1422_vm0 = vweird.f32 %v1401_v39  ;;  %vm1409_vm1 = vmor %vm1407_vm15, %vm1408_vm11 }
 0x3a0   :  { %v1460_v44 = vrot.slane %v1459_v41, 4  ;;  %v1404_v50 = vsub.f32 1.0, %v1403_v42  ;;  %v1457_v51 = vrot.slane %v1456_v43, 1  ;;  %v1426_v5 = vand.u32 2147483647, %v1401_v39 }
 0x3a1   :  { %v1429_v11 = vor.u32 1.1754944e-38, %v1428_v4 }
 0x3a2   :  { %v1461_v47 = vadd.f32 %v1460_v44, %v1459_v41  ;;  %v1405_v57 = vmul.f32 %v1632_v38, %v1404_v50  ;;  %v1458_v58 = vadd.f32 %v1457_v51, %v1456_v43  ;;  %vm1427_vm3 = vcmp.eq.f32.partialorder %v1426_v5, 8.507059e+37 }
 0x3a4   :  { %v1462_v52 = vrot.slane %v1461_v47, 2  ;;  %v1406_v36 = vadd.f32 %v1632_v38, %v1405_v57  ;;  %v1475_v0 = vmax.f32 %v1458_v58, 1.0 }
 0x3a5   :  { %v1634_v54 = vpop.eup %1633 }
 0x3a6   :  { %v1463_v55 = vadd.f32 %v1462_v52, %v1461_v47  ;;  %v1418_v56 = vmul.f32 %v1634_v54, %v1401_v39  ;;  %vm1423_vm13 = vweird.f32 %v1634_v54  ;;  %v1410_v10 = vsel %vm1409_vm1, %v1632_v38, %v1406_v36 }
 0x3a7   :  { %vm1424_vm2 = vmor %vm1422_vm0, %vm1423_vm13  ;;  %v1415_v16 = vsel %vm1412_vm4, %v1414_v12, %v1410_v10  ;;  %vm1466_vm0 = vcmp.gt.f32.partialorder %v2187_v62, 0.0  ;;  %vm1527_vm4 = vcmp.eq.s32.totalorder %v1904_v30, 1 }
 0x3a8   :  { %v1464_v59 = vrot.slane %v1463_v55, 1  ;;  %v1419_v60 = vsub.f32 1.0, %v1418_v56 }
 0x3aa   :  { %v1465_v61 = vadd.f32 %v1464_v59, %v1463_v55  ;;  %v1420_v63 = vmul.f32 %v1634_v54, %v1419_v60  ;;  %v1024_v55 = vsub.f32 %v2151_v53, %v2194_v8 }
 0x3ac   :  { %v1476_v2 = vmax.f32 %v1465_v61, 1.0  ;;  %v1421_v3 = vadd.f32 %v1634_v54, %v1420_v63 }
 0x3ae   :  { %v2215_v7 = vsel %vm1469_vm12, %v1476_v2, %v1475_v0  ;;  %v1425_v9 = vsel %vm1424_vm2, %v1634_v54, %v1421_v3  ;;  %vm1108_vm2 = vcmask 1041409  }
 0x3af   :  { %1635 = vrcp.f32 %v2215_v7  ;;  %v1430_v13 = vsel %vm1427_vm3, %v1429_v11, %v1425_v9  ;;  %v1490_v59 = vand.u32 2147483647, %v2215_v7  ;;  %v1492_v60 = vand.u32 2147483648, %v2215_v7 }
 0x3b0   :  { %vm1486_vm10 = vweird.f32 %v2215_v7  ;;  %vm1511_vm3 = vcmask 1024  }
 0x3b1   :  { %vm1491_vm13 = vcmp.eq.f32.partialorder %v1490_v59, 8.507059e+37  ;;  %v1493_v53 = vor.u32 1.1754944e-38, %v1492_v60 }
 0x3b2   :  { %v1397_v14 = vpop.xlane.xlu2 %1396 }
 0x3b3   :  { %v1394_v18 = vpop.xlane.xlu0 %1393  ;;  %v1431_v49 = vmul.f32 %v1430_v13, %v1397_v14 }
 0x3b4   :  { %v1416_v19 = vmul.f32 %v1415_v16, %v1394_v18 }
 0x3b5   :  { %v1636_v22 = vpop.eup %1635  ;;  %v1433_v23 = vsel %vm1399_vm6, %v1431_v49, 0.0  ;;  %vm1525_vm6 = vcmp.eq.s32.totalorder %v1904_v30, 0 }
 0x3b6   :  { %v1432_v21 = vsel %vm1398_vm7, %v1416_v19, 0.0  ;;  %v1435_v25 = vmul.f32 %v1433_v23, %v2181_v34  ;;  %v1482_v28 = vmul.f32 %v1636_v22, %v2215_v7  ;;  %vm1487_vm8 = vweird.f32 %v1636_v22 }
 0x3b7   :  { %v1434_v15 = vmul.f32 %v1432_v21, %v2181_v34  ;;  %vm1488_vm11 = vmor %vm1486_vm10, %vm1487_vm8 }
 0x3b8   :  { %v1443_v26 = vsel %vm1373_vm5, %v1435_v25, 0.0  ;;  %v1483_v38 = vsub.f32 1.0, %v1482_v28 }
 0x3b9   :  { %v1436_v17 = vsel %vm1373_vm5, %v1434_v15, 0.0  ;;  %v1444_v29 = vrot.slane %v1443_v26, 4 }
 0x3ba   :  { %v1437_v45 = vrot.slane %v1436_v17, 4  ;;  %v1038_v31 = vpop.permute.xlu2 %1037  ;;  %v1484_v50 = vmul.f32 %v1636_v22, %v1483_v38 }
 0x3bb   :  { %v1445_v27 = vadd.f32 %v1444_v29, %v1443_v26  ;;  %v1057_v37 = vmul.f32 %v1038_v31, %v1022_v20 }
 0x3bc   :  { %v1438_v35 = vadd.f32 %v1437_v45, %v1436_v17  ;;  %v1485_v56 = vadd.f32 %v1636_v22, %v1484_v50 }
 0x3bd   :  { %v1446_v39 = vrot.slane %v1445_v27, 2  ;;  %v1061_v41 = vand.u32 2147483647, %v1057_v37  ;;  %v1069_v34 = vmul.f32 0.5, %v1057_v37 }
 0x3be   :  { %v1439_v40 = vrot.slane %v1438_v35, 2  ;;  %v1489_v2 = vsel %vm1488_vm11, %v1636_v22, %v1485_v56 }
 0x3bf   :  { %v1447_v42 = vadd.f32 %v1446_v39, %v1445_v27  ;;  %v1073_v44 = vmul.f32 %v1069_v34, %v1057_v37  ;;  %vm1065_vm5 = vcmp.lt.f32.partialorder %v1061_v41, 1.0  ;;  %v1591_v47 = vadd.f32 -0.5, %v1061_v41 }
 0x3c0   :  { %v1440_v43 = vadd.f32 %v1439_v40, %v1438_v35  ;;  %v1494_v5 = vsel %vm1491_vm13, %v1493_v53, %v1489_v2 }
 0x3c1   :  { %v1448_v51 = vrot.slane %v1447_v42, 1  ;;  %v1081_v48 = vsel %vm1065_vm5, %v1073_v44, %v1591_v47 }
 0x3c2   :  { %v1441_v52 = vrot.slane %v1440_v43, 1  ;;  %1092 = vperm.xlu0 %1626, %v1081_v48  }
 0x3c3   :  { %v1449_v24 = vadd.f32 %v1448_v51, %v1447_v42 }
 0x3c4   :  { %v1442_v54 = vadd.f32 %v1441_v52, %v1440_v43 }
 0x3c6   :  { %v1051_v57 = vpop.permute.xlu0 %1050  ;;  %v1470_v58 = vsel %vm1469_vm12, %v1449_v24, %v1442_v54  ;;  %vm1500_vm12 = vcmask 97286  }
 0x3c7   :  { %v1059_v61 = vmul.f32 %v1051_v57, %v1024_v55  ;;  %v1472_v63 = vsub.f32 %v2187_v62, %v1470_v58 }
 0x3c9   :  { %v1063_v36 = vand.u32 2147483647, %v1059_v61  ;;  %v1071_v32 = vmul.f32 0.5, %v1059_v61  ;;  %v1473_v0 = vmul.f32 %v1472_v63, %v1472_v63 }
 0x3cb   :  { %v1075_v8 = vmul.f32 %v1071_v32, %v1059_v61  ;;  %vm1067_vm15 = vcmp.lt.f32.partialorder %v1063_v36, 1.0  ;;  %v1593_v3 = vadd.f32 -0.5, %v1063_v36  ;;  %v1474_v4 = vmul.f32 0.5, %v1473_v0 }
 0x3cd   :  { %v1083_v6 = vsel %vm1067_vm15, %v1075_v8, %v1593_v3  ;;  %v1495_v9 = vmul.f32 %v1494_v5, %v1474_v4 }
 0x3ce   :  { %1098 = vperm.xlu0 %1626, %v1083_v6  }
 0x3cf   :  { %v1496_v10 = vsel %vm1466_vm0, %v1495_v9, 0.0  ;;  %v1090_v11 = vpop.permute.xlu0 %1089 }
 0x3d0   :  { %v1501_v7 = vsel %vm1500_vm12, %v1496_v10, 0.0  ;;  %v1100_v19 = vperm.slane %v1090_v11, %v1904_v30 }
 0x3d1   :  { %1502 = vadd.xlane.f32.xlu1 %v1501_v7 }
 0x3f3   :  { %v1124_v12 = vpop.xlane.xlu2 %1123 }
 0x3f4   :  { %vm1497_vm1 = vcmp.eq.f32.partialorder %v1124_v12, 0.0  ;;  %v1125_v29 = vrot.slane %v1124_v12, 4 }
 0x3f5   :  { %v1595_v49 = vsel %vm1497_vm1, 1.0, %v1826_v33 }
 0x3f6   :  { %v1505_v62 = vrot.slane %v1595_v49, 2  ;;  %v1126_v45 = vadd.f32 %v1125_v29, %v1124_v12 }
 0x3fb   :  { %v1096_v14 = vpop.permute.xlu2 %1095 }
 0x3fc   :  { %v1105_v22 = vperm.slane %v1096_v14, %v1904_v30 }
 0x434   :  { %v1093_v13 = vpop.permute.xlu0 %1092 }
 0x435   :  { %v1102_v16 = vperm.slane %v1093_v13, %v2140_v46 }
 0x437   :  { %v1104_v21 = vsel %vm1103_vm14, %v1102_v16, %v1100_v19 }
 0x440   :  { %v1099_v18 = vpop.permute.xlu0 %1098 }
 0x441   :  { %v1106_v23 = vperm.slane %v1099_v18, %v2140_v46  ;;  %v1127_v46 = vrot.slane %v1126_v45, 2 }
 0x443   :  { %v1107_v25 = vsel %vm1103_vm14, %v1106_v23, %v1105_v22  ;;  %v1128_v38 = vadd.f32 %v1127_v46, %v1126_v45  ;;  %vm1524_vm14 = vcmp.eq.s32.totalorder %v1893_v1, 0 }
 0x444   :  { %v1503_v15 = vpop.xlane.xlu1 %1502  ;;  %v1109_v26 = vsel %vm1108_vm2, %v1107_v25, %v1104_v21  ;;  %vm1528_vm5 = vmand %vm1524_vm14, %vm1527_vm4 }
 0x445   :  { %v1507_v17 = vmul.f32 %v1505_v62, %v1503_v15  ;;  %v1112_v28 = vsel %vm1111_vm9, %v1109_v26, 0.0  ;;  %v1129_v42 = vrot.slane %v1128_v38, 1  ;;  %vm1529_vm9 = vcmp.eq.s32.totalorder %v1904_v30, 2  ;;  %vm1526_vm8 = vmand %vm1524_vm14, %vm1525_vm6 }
 0x446   :  { %1113 = vadd.xlane.f32.xlu1 %v1112_v28  ;;  %vm1530_vm7 = vmand %vm1524_vm14, %vm1529_vm9 }
 0x447   :  { %v1509_v33 = vrot.slane %v1507_v17, 6  ;;  %v1130_v51 = vadd.f32 %v1129_v42, %v1128_v38 }
 0x449   :  { %v1512_v20 = vsel %vm1511_vm3, %v1509_v33, 0.0 }
 0x44a   :  { %1513 = vadd.xlane.f32.xlu0 %v1512_v20 }
 0x4b9   :  { %v1114_v31 = vpop.xlane.xlu1 %1113 }
 0x4ba   :  { %v1115_v27 = vrot.slane %v1114_v31, 4 }
 0x4bc   :  { %v1116_v35 = vadd.f32 %v1115_v27, %v1114_v31 }
 0x4bd   :  { %v1514_v37 = vpop.xlane.xlu0 %1513 }
 0x4be   :  { %v1117_v39 = vrot.slane %v1116_v35, 2  ;;  %v1515_v40 = vrot.slane %v1514_v37, 4 }
 0x4c0   :  { %v1516_v41 = vadd.f32 %v1515_v40, %v1514_v37  ;;  %v1118_v34 = vadd.f32 %v1117_v39, %v1116_v35 }
 0x4c2   :  { %v1517_v43 = vrot.slane %v1516_v41, 2  ;;  %v1119_v44 = vrot.slane %v1118_v34, 1 }
 0x4c4   :  { %v1518_v47 = vadd.f32 %v1517_v43, %v1516_v41  ;;  %v1120_v50 = vadd.f32 %v1119_v44, %v1118_v34 }
 0x4c6   :  { %1596 = vpush %v1120_v50  ;;  %v1519_v52 = vrot.slane %v1518_v47, 1 }
 0x4c7   :  { %1598 = vpush %v1130_v51 }
 0x4c8   :  { %v1520_v48 = vadd.f32 %v1519_v52, %v1518_v47 }
 0x4ca   :  { %1600 = vpush %v1520_v48 }
 0x4f7   :  { %s1597_s3 = spop %1596 }
 0x4f8   :  { %s1599_s15 = spop %1598  ;;  %v1535_v55 = vstv %s1597_s3 }
 0x4f9   :  { %v1533_v1 = vstv %s1599_s15 }
 0x4fb   :  { %s1601_s1 = spop %1600 }
 0x4fc   :  { %v1531_v24 = vstv %s1601_s1 }
 0x4fd   :  { %v1532_v54 = vsel %vm1530_vm7, %v1531_v24, 0.0 }
 0x4fe   :  { %v1534_v56 = vsel %vm1528_vm5, %v1533_v1, %v1532_v54 }
 0x4ff   :  { %v1536_v57 = vsel %vm1526_vm8, %v1535_v55, %v1534_v56 }
 0x500   :  { %1537 = vst [vmem:[#allocation13] sm:$0xff] %v1536_v57 }
 0x501   :  { %1548 = dma.vmem_to_hbm [thread:$0]  %s1544_s17, 128, %s1546_s20, [#allocation4]  }
 0x502   :  { %1813 = dma.done.wait [#allocation4], 128  }
 0x503   :  { %1814 = vsyncadd [#allocation4], 4294967168 }
 0x504   :  { %1553 = vsyncpa [#allocation3], 1 }
 0x505   :  { %1554 = vsyncpa [#allocation6], 1 }
 0x506   :  { %1555 = vsyncpa [#allocation9], 1 }
 0x507   :  { %1556 = vsyncpa [#allocation12], 1 }
 0x508   :  { %1557 = vsyncpa [#allocation4], 1 }

</bundles_post_ra>
